<compile_context>
chip_gen: v5e
topology: v5e:2x2
jax: 0.10.0
libtpu: 0.0.40
codegen_flags: <defaults>
</compile_context>

<pallas_src>
import functools
import math

import jax
import jax.numpy as jnp
from jax.experimental import pallas as pl
from jax.experimental.pallas import tpu as pltpu


# ----------------------------- Pallas kernel ------------------------------

def _filter_layer_kernel(x_ref, w1t_ref, b1_ref, w2t_ref, b2_ref, o_ref, acc_ref,
                         *, inv_hw, hw_total, chunk, needs_mask):
    # x_ref:   (1, C, chunk)  spatial chunk of one image in native NCHW layout
    # w1t_ref: (hidden, C)    b1_ref: (hidden, 1)
    # w2t_ref: (out, hidden)  b2_ref: (out, 1)
    # o_ref:   (1, out, 1)    acc_ref: (C, 1) f32 VMEM scratch (running spatial sum)
    s = pl.program_id(1)

    @pl.when(s == 0)
    def _init():
        acc_ref[...] = jnp.zeros_like(acc_ref)

    # Partial spatial sum for this chunk; always accumulate in f32.
    x = x_ref[0].astype(jnp.float32)                                # (C, chunk)
    if needs_mask:
        col = jax.lax.broadcasted_iota(jnp.int32, x.shape, 1)
        x = jnp.where(col < hw_total - s * chunk, x, 0.0)           # zero the OOB tail
    acc_ref[...] += jnp.sum(x, axis=-1, keepdims=True)              # (C, 1)

    @pl.when(s == pl.num_programs(1) - 1)
    def _finalize():
        pooled = acc_ref[...] * inv_hw                               # (C, 1)
        h = jnp.dot(w1t_ref[...].astype(jnp.float32), pooled,
                    preferred_element_type=jnp.float32)
        h = jnp.maximum(h + b1_ref[...].astype(jnp.float32), 0.0)    # ReLU
        y = jnp.dot(w2t_ref[...].astype(jnp.float32), h,
                    preferred_element_type=jnp.float32)
        y = jax.nn.sigmoid(y + b2_ref[...].astype(jnp.float32))      # (out, 1)
        o_ref[0] = y.astype(o_ref.dtype)


def _pick_chunk(hw, c, itemsize, cap_bytes):
    """Spatial chunk (lane axis) sized by *bytes*, not rows.

    Whole image if it fits the cap (single fat grid step, small-image fast path);
    otherwise the largest multiple-of-128 chunk whose (C, chunk) block stays
    within cap_bytes.
    """
    if hw * c * itemsize <= cap_bytes:
        return hw
    return max(128, (cap_bytes // (c * itemsize)) // 128 * 128)


def filter_layer_forward(x_nchw, params, *, chunk_cap_bytes=4 * 1024 * 1024):
    """FilterLayer forward: (N, C, H, W) -> (N, out_planes, 1, 1)."""
    N, C, H, W = x_nchw.shape
    hidden = params["w1"].shape[1]
    out_planes = params["w2"].shape[1]
    HW = H * W

    # Free reshape (merges contiguous dims); no transpose and no dtype cast of x in HBM.
    x = x_nchw.reshape(N, C, HW)

    itemsize = jnp.dtype(x.dtype).itemsize
    chunk = _pick_chunk(HW, C, itemsize, chunk_cap_bytes)
    n_chunks = (HW + chunk - 1) // chunk
    needs_mask = (HW % chunk) != 0

    # Pre-transposed weights: the (C, 1) pooled column feeds the MXU directly.
    w1t = params["w1"].T                                    # (hidden, C)
    b1 = params["b1"].reshape(hidden, 1)
    w2t = params["w2"].T                                    # (out_planes, hidden)
    b2 = params["b2"].reshape(out_planes, 1)

    kernel = functools.partial(_filter_layer_kernel,
                               inv_hw=1.0 / float(HW), hw_total=HW,
                               chunk=chunk, needs_mask=needs_mask)

    out = pl.pallas_call(
        kernel,
        out_shape=jax.ShapeDtypeStruct((N, out_planes, 1), x_nchw.dtype),
        grid_spec=pltpu.PrefetchScalarGridSpec(
            num_scalar_prefetch=0,
            grid=(N, n_chunks),
            in_specs=[
                pl.BlockSpec((1, C, chunk), lambda n, s: (n, 0, s)),
                pl.BlockSpec((hidden, C), lambda n, s: (0, 0)),
                pl.BlockSpec((hidden, 1), lambda n, s: (0, 0)),
                pl.BlockSpec((out_planes, hidden), lambda n, s: (0, 0)),
                pl.BlockSpec((out_planes, 1), lambda n, s: (0, 0)),
            ],
            out_specs=pl.BlockSpec((1, out_planes, 1), lambda n, s: (n, 0, 0)),
            scratch_shapes=[pltpu.VMEM((C, 1), jnp.float32)],
        ),
        compiler_params=pltpu.CompilerParams(
            dimension_semantics=("parallel", "arbitrary"),
            # 2 x (<=4 MiB) double-buffered x tile + double-buffered weights stays
            # comfortably under this on v5e / v6e / v7x.
            vmem_limit_bytes=32 * 1024 * 1024),
    )(x, w1t, b1, w2t, b2)

    return out.reshape(N, out_planes, 1, 1)


# ----------------------------- parameters ---------------------------------

def init_filter_layer_params(key, in_planes, out_planes, reduction=16):
    """PyTorch nn.Linear-style uniform init; weights stored (in, out) for x @ W."""
    hidden = out_planes // reduction
    k1, k2, k3, k4 = jax.random.split(key, 4)
    lim1 = 1.0 / math.sqrt(in_planes)
    lim2 = 1.0 / math.sqrt(hidden)
    return {
        "w1": jax.random.uniform(k1, (in_planes, hidden), jnp.float32, -lim1, lim1),
        "b1": jax.random.uniform(k2, (hidden,), jnp.float32, -lim1, lim1),
        "w2": jax.random.uniform(k3, (hidden, out_planes), jnp.float32, -lim2, lim2),
        "b2": jax.random.uniform(k4, (out_planes,), jnp.float32, -lim2, lim2),
    }


# ----------------------------- reference ----------------------------------

def filter_layer_ref(x_nchw, params):
    pooled = jnp.mean(x_nchw.astype(jnp.float32), axis=(2, 3))          # (N, C)
    h = jnp.maximum(pooled @ params["w1"] + params["b1"], 0.0)
    y = jax.nn.sigmoid(h @ params["w2"] + params["b2"])
    return y.reshape(x_nchw.shape[0], -1, 1, 1)


# ----------------------------- main ----------------------------------------

if __name__ == "__main__":
    IN_PLANES, OUT_PLANES, REDUCTION = 128, 256, 16       # hidden = 16
    key = jax.random.PRNGKey(0)
    kx, kx2, kp = jax.random.split(key, 3)
    params = init_filter_layer_params(kp, IN_PLANES, OUT_PLANES, REDUCTION)

    # 1) Small, divisible spatial extent -> single-chunk fast path.
    x = jax.random.normal(kx, (2, IN_PLANES, 16, 16), jnp.float32)   # NCHW like PyTorch
    out = jax.block_until_ready(filter_layer_forward(x, params))
    assert out.shape == (2, OUT_PLANES, 1, 1), out.shape
    ref = filter_layer_ref(x, params)
    assert jnp.allclose(out, ref, atol=1e-5, rtol=1e-5), \
        float(jnp.max(jnp.abs(out - ref)))

    # 2) Odd spatial extent (17x17 -> HW=289) with a tiny byte cap to force the
    #    chunked + masked-tail path (DeepLab 129x129-style feature maps).
    x2 = jax.random.normal(kx2, (2, IN_PLANES, 17, 17), jnp.float32)
    out2 = jax.block_until_ready(
        filter_layer_forward(x2, params, chunk_cap_bytes=128 * 128 * 4))
    ref2 = filter_layer_ref(x2, params)
    assert jnp.allclose(out2, ref2, atol=1e-5, rtol=1e-5), \
        float(jnp.max(jnp.abs(out2 - ref2)))

    print("KERNEL_OK")
</pallas_src>

<mosaic_0001>
module attributes {stable_mosaic.version = 11 : i64} {
  func.func @_filter_layer_kernel(%arg0: i32, %arg1: i32, %arg2: memref<1x128x256xf32, #tpu.memory_space<vmem>>, %arg3: memref<16x128xf32, #tpu.memory_space<vmem>>, %arg4: memref<16x1xf32, #tpu.memory_space<vmem>>, %arg5: memref<256x16xf32, #tpu.memory_space<vmem>>, %arg6: memref<256x1xf32, #tpu.memory_space<vmem>>, %arg7: memref<1x256x1xf32, #tpu.memory_space<vmem>>, %arg8: memref<128x1xf32, #tpu.memory_space<vmem>>) attributes {dimension_semantics = [#tpu.dimension_semantics<parallel>, #tpu.dimension_semantics<arbitrary>], iteration_bounds = array<i64: 2, 1>, scalar_prefetch = 0 : i64, scratch_operands = 1 : i64, tpu.core_type = #tpu.core_type<tc>, window_params = [{transform_indices = @transform_0, window_bounds = array<i64: 1, 128, 256>}, {pipeline_mode = #tpu.pipeline_mode<synchronous>, transform_indices = @transform_1, window_bounds = array<i64: 16, 128>}, {pipeline_mode = #tpu.pipeline_mode<synchronous>, transform_indices = @transform_2, window_bounds = array<i64: 16, 1>}, {pipeline_mode = #tpu.pipeline_mode<synchronous>, transform_indices = @transform_3, window_bounds = array<i64: 256, 16>}, {pipeline_mode = #tpu.pipeline_mode<synchronous>, transform_indices = @transform_4, window_bounds = array<i64: 256, 1>}, {transform_indices = @transform_5, window_bounds = array<i64: 1, 256, 1>}]} {
    %c0_i32 = arith.constant 0 : i32
    %0 = arith.cmpi eq, %arg1, %c0_i32 : i32
    %1 = arith.extui %0 : i1 to i32
    %c0_i32_0 = arith.constant 0 : i32
    %2 = arith.cmpi ne, %1, %c0_i32_0 : i32
    scf.if %2 {
      %cst_9 = arith.constant 0.000000e+00 : f32
      %13 = vector.broadcast %cst_9 : f32 to vector<128x1xf32>
      %c0_10 = arith.constant 0 : index
      %c0_11 = arith.constant 0 : index
      %14 = vector.load %arg8[%c0_10, %c0_11] : memref<128x1xf32, #tpu.memory_space<vmem>>, vector<128x1xf32>
      tpu.vector_store %arg8[%c0_10, %c0_11], %13 {strides = array<i32>} : memref<128x1xf32, #tpu.memory_space<vmem>>, vector<128x1xf32>,
    } else {
    }
    %c0 = arith.constant 0 : index
    %c0_1 = arith.constant 0 : index
    %c0_2 = arith.constant 0 : index
    %3 = vector.load %arg2[%c0, %c0_1, %c0_2] : memref<1x128x256xf32, #tpu.memory_space<vmem>>, vector<1x128x256xf32>
    %4 = vector.shape_cast %3 : vector<1x128x256xf32> to vector<128x256xf32>
    %c0_3 = arith.constant 0 : index
    %c0_4 = arith.constant 0 : index
    %5 = vector.load %arg8[%c0_3, %c0_4] : memref<128x1xf32, #tpu.memory_space<vmem>>, vector<128x1xf32>
    %cst = arith.constant dense<0.000000e+00> : vector<128xf32>
    %6 = vector.multi_reduction <add>, %4, %cst [1] : vector<128x256xf32> to vector<128xf32>
    %7 = vector.shape_cast %6 : vector<128xf32> to vector<128x1xf32>
    %8 = arith.addf %5, %7 : vector<128x1xf32>
    %c0_5 = arith.constant 0 : index
    %c0_6 = arith.constant 0 : index
    %9 = vector.load %arg8[%c0_5, %c0_6] : memref<128x1xf32, #tpu.memory_space<vmem>>, vector<128x1xf32>
    tpu.vector_store %arg8[%c0_5, %c0_6], %8 {strides = array<i32>} : memref<128x1xf32, #tpu.memory_space<vmem>>, vector<128x1xf32>,
    %c0_i32_7 = arith.constant 0 : i32
    %10 = arith.cmpi eq, %arg1, %c0_i32_7 : i32
    %11 = arith.extui %10 : i1 to i32
    %c0_i32_8 = arith.constant 0 : i32
    %12 = arith.cmpi ne, %11, %c0_i32_8 : i32
    scf.if %12 {
      %c0_9 = arith.constant 0 : index
      %c0_10 = arith.constant 0 : index
      %13 = vector.load %arg8[%c0_9, %c0_10] : memref<128x1xf32, #tpu.memory_space<vmem>>, vector<128x1xf32>
      %cst_11 = arith.constant 3.906250e-03 : f32
      %14 = vector.broadcast %cst_11 : f32 to vector<128x1xf32>
      %15 = arith.mulf %13, %14 : vector<128x1xf32>
      %c0_12 = arith.constant 0 : index
      %c0_13 = arith.constant 0 : index
      %16 = vector.load %arg3[%c0_12, %c0_13] : memref<16x128xf32, #tpu.memory_space<vmem>>, vector<16x128xf32>
      %cst_14 = arith.constant dense<0.000000e+00> : vector<16x1xf32>
      %17 = tpu.matmul %16, %15, %cst_14 {dimension_numbers = #tpu.dot_dimension_numbers<[1], [0], [0], [1], [0, 0, 1, 1], [], []>} : vector<16x128xf32>, vector<128x1xf32>, vector<16x1xf32> -> vector<16x1xf32>
      %c0_15 = arith.constant 0 : index
      %c0_16 = arith.constant 0 : index
      %18 = vector.load %arg4[%c0_15, %c0_16] : memref<16x1xf32, #tpu.memory_space<vmem>>, vector<16x1xf32>
      %19 = arith.addf %17, %18 : vector<16x1xf32>
      %cst_17 = arith.constant 0.000000e+00 : f32
      %20 = vector.broadcast %cst_17 : f32 to vector<16x1xf32>
      %21 = arith.maximumf %19, %20 : vector<16x1xf32>
      %c0_18 = arith.constant 0 : index
      %c0_19 = arith.constant 0 : index
      %22 = vector.load %arg5[%c0_18, %c0_19] : memref<256x16xf32, #tpu.memory_space<vmem>>, vector<256x16xf32>
      %cst_20 = arith.constant dense<0.000000e+00> : vector<256x1xf32>
      %23 = tpu.matmul %22, %21, %cst_20 {dimension_numbers = #tpu.dot_dimension_numbers<[1], [0], [0], [1], [0, 0, 1, 1], [], []>} : vector<256x16xf32>, vector<16x1xf32>, vector<256x1xf32> -> vector<256x1xf32>
      %c0_21 = arith.constant 0 : index
      %c0_22 = arith.constant 0 : index
      %24 = vector.load %arg6[%c0_21, %c0_22] : memref<256x1xf32, #tpu.memory_space<vmem>>, vector<256x1xf32>
      %25 = arith.addf %23, %24 : vector<256x1xf32>
      %26 = arith.negf %25 : vector<256x1xf32>
      %27 = math.exp %26 : vector<256x1xf32>
      %cst_23 = arith.constant 1.000000e+00 : f32
      %28 = vector.broadcast %cst_23 : f32 to vector<256x1xf32>
      %29 = arith.addf %28, %27 : vector<256x1xf32>
      %30 = arith.divf %28, %29 : vector<256x1xf32>
      %c0_24 = arith.constant 0 : index
      %c0_25 = arith.constant 0 : index
      %c0_26 = arith.constant 0 : index
      %31 = vector.load %arg7[%c0_24, %c0_25, %c0_26] : memref<1x256x1xf32, #tpu.memory_space<vmem>>, vector<1x256x1xf32>
      %32 = vector.shape_cast %31 : vector<1x256x1xf32> to vector<256x1xf32>
      %33 = vector.shape_cast %30 : vector<256x1xf32> to vector<1x256x1xf32>
      tpu.vector_store %arg7[%c0_24, %c0_25, %c0_26], %33 {strides = array<i32>} : memref<1x256x1xf32, #tpu.memory_space<vmem>>, vector<1x256x1xf32>,
    } else {
    }
    return
  }
  func.func @transform_0(%arg0: i32, %arg1: i32) -> (i32, i32, i32) {
    %c0_i32 = arith.constant 0 : i32
    %c0_i32_0 = arith.constant 0 : i32
    return %arg0, %c0_i32, %arg1 : i32, i32, i32
  }
  func.func @transform_1(%arg0: i32, %arg1: i32) -> (i32, i32) {
    %c0_i32 = arith.constant 0 : i32
    %c0_i32_0 = arith.constant 0 : i32
    %c0_i32_1 = arith.constant 0 : i32
    return %c0_i32, %c0_i32_0 : i32, i32
  }
  func.func @transform_2(%arg0: i32, %arg1: i32) -> (i32, i32) {
    %c0_i32 = arith.constant 0 : i32
    %c0_i32_0 = arith.constant 0 : i32
    %c0_i32_1 = arith.constant 0 : i32
    return %c0_i32, %c0_i32_0 : i32, i32
  }
  func.func @transform_3(%arg0: i32, %arg1: i32) -> (i32, i32) {
    %c0_i32 = arith.constant 0 : i32
    %c0_i32_0 = arith.constant 0 : i32
    %c0_i32_1 = arith.constant 0 : i32
    return %c0_i32, %c0_i32_0 : i32, i32
  }
  func.func @transform_4(%arg0: i32, %arg1: i32) -> (i32, i32) {
    %c0_i32 = arith.constant 0 : i32
    %c0_i32_0 = arith.constant 0 : i32
    %c0_i32_1 = arith.constant 0 : i32
    return %c0_i32, %c0_i32_0 : i32, i32
  }
  func.func @transform_5(%arg0: i32, %arg1: i32) -> (i32, i32, i32) {
    %c0_i32 = arith.constant 0 : i32
    %c0_i32_0 = arith.constant 0 : i32
    %c0_i32_1 = arith.constant 0 : i32
    return %arg0, %c0_i32, %c0_i32_0 : i32, i32, i32
  }
}

</mosaic_0001>

<bundles_post_ra>
// kernel: tpu_custom_call.1
= control target key start
LH: loop header
LB: loop body
LE: loop exit
PB: predicated region body
PF: predicated region fallthrough
CT: control target
= control target key end

     0   :  { %s1741_s18 = smov 0   ;;  %s1743_s19 = smov 0   ;;  %s2575_s0 = inlined_call_operand.vmem [shape: f32[2,128,256], index: 0, kind: input, shape index: {}]   ;;  %s2576_s1 = inlined_call_operand.vmem [shape: f32[16,128], index: 1, kind: input, shape index: {}]   ;;  %s2577_s2 = inlined_call_operand.vmem [shape: f32[16,1], index: 2, kind: input, shape index: {}]   ;;  %s2578_s3 = inlined_call_operand.vmem [shape: f32[256,16], index: 3, kind: input, shape index: {}]   ;;  %s2579_s4 = inlined_call_operand.vmem [shape: f32[256,1], index: 4, kind: input, shape index: {}]   ;;  %s2580_s5 = inlined_call_operand.vmem [shape: f32[2,256,1], index: 5, kind: output, shape index: {}]  }
   0x1   :  { %s1745_s20 = smov 0  }
   0x2 LB: > { %s27_s21 = sadd.s32 1, %s1704_s19  ;;  %p1454_p0 = scmp.ge.s32.totalorder %s1708_s20, 1  ;;  %s1708_s20 = sphi %s1745_s20, %s15_s20   ;;  %s1704_s19 = sphi %s1743_s19, %s2632_s19   ;;  %s1700_s18 = sphi %s1741_s18, %s2631_s18  }
   0x3   : > { %p29_p1 = scmp.ge.s32.totalorder %s27_s21, 2  ;;  %p206_p2 = scmp.lt.s32.totalorder %s1708_s20, 3 }
   0x5   : > { %s2634_s21 = smov (%p29_p1, %s27_s21), 0  ;;  %p207_p3 = pnand %p1454_p0, %p206_p2 }
   0x6   : > { %p239_p4 = scmp.lt.s32.totalorder (!%p207_p3), %s1700_s18, 1 }
   0x7   : > { %210 = sbr.rel (%p207_p3) target bundleno = 616 (0x268), region = 40 }
   0xc   : > { %s2636_s18 = smov (!%p239_p4, %s1700_s18), 1  ;;  %vm257_vm0 = vcmask 7168   ;;  %v1710_v21 = vmov 0.0   ;;  %vm531_vm1 = vcmask 130048  }
   0xd   : > { %s1525_s22 = sshll.u32 %s2636_s18, 8  ;;  %273 = vst.msk [vmem:[#allocation2 + $0x78] sm:$0xff] %vm257_vm0, %v1710_v21 }
   0xe   : > { %s1767_s25 = scalar_lea.vmem %s2575_s0, %s1525_s22  ;;  %258 = vst.msk [vmem:[#allocation2] sm:$0xff] %vm257_vm0, %v1710_v21  ;;  %s2031_s13 = scalar_lea.vmem %s2580_s5, %s1525_s22 }
   0xf   : > { %v304_v0 = vld [vmem:[%s1767_s25 + $0xf0] sm:$0xff]  ;;  %v305_v1 = vld [vmem:[%s1767_s25 + $0xf8] sm:$0xff]  ;;  %v302_v9 = vld [vmem:[%s1767_s25 + $0xe0] sm:$0xff]  ;;  %259 = vst.msk [vmem:[#allocation2 + $0x8] sm:$0xff] %vm257_vm0, %v1710_v21 }
  0x10   : > { %v300_v2 = vld [vmem:[%s1767_s25 + $0xd0] sm:$0xff]  ;;  %v367_v3 = vadd.f32 %v305_v1, %v304_v0  ;;  %v301_v4 = vld [vmem:[%s1767_s25 + $0xd8] sm:$0xff]  ;;  %v303_v10 = vld [vmem:[%s1767_s25 + $0xe8] sm:$0xff]  ;;  %260 = vst.msk [vmem:[#allocation2 + $0x10] sm:$0xff] %vm257_vm0, %v1710_v21 }
  0x11   : > { %v296_v5 = vld [vmem:[%s1767_s25 + $0xb0] sm:$0xff]  ;;  %v297_v6 = vld [vmem:[%s1767_s25 + $0xb8] sm:$0xff]  ;;  %v361_v7 = vadd.f32 %v301_v4, %v300_v2  ;;  %v298_v11 = vld [vmem:[%s1767_s25 + $0xc0] sm:$0xff]  ;;  %v364_v15 = vadd.f32 %v303_v10, %v302_v9  ;;  %261 = vst.msk [vmem:[#allocation2 + $0x18] sm:$0xff] %vm257_vm0, %v1710_v21 }
  0x12   : > { %v355_v8 = vadd.f32 %v297_v6, %v296_v5  ;;  %368 = vadd.xlane.f32.xlu0 %v367_v3  ;;  %v299_v12 = vld [vmem:[%s1767_s25 + $0xc8] sm:$0xff]  ;;  %v294_v13 = vld [vmem:[%s1767_s25 + $0xa0] sm:$0xff]  ;;  %v292_v18 = vld [vmem:[%s1767_s25 + $0x90] sm:$0xff]  ;;  %262 = vst.msk [vmem:[#allocation2 + $0x20] sm:$0xff] %vm257_vm0, %v1710_v21 }
  0x13   : > { %362 = vadd.xlane.f32.xlu1 %v361_v7  ;;  %v295_v14 = vld [vmem:[%s1767_s25 + $0xa8] sm:$0xff]  ;;  %v358_v16 = vadd.f32 %v299_v12, %v298_v11  ;;  %v293_v19 = vld [vmem:[%s1767_s25 + $0x98] sm:$0xff]  ;;  %v290_v20 = vld [vmem:[%s1767_s25 + $0x80] sm:$0xff]  ;;  %263 = vst.msk [vmem:[#allocation2 + $0x28] sm:$0xff] %vm257_vm0, %v1710_v21 }
  0x14   : > { %356 = vadd.xlane.f32.xlu2 %v355_v8  ;;  %v352_v17 = vadd.f32 %v295_v14, %v294_v13  ;;  %v291_v22 = vld [vmem:[%s1767_s25 + $0x88] sm:$0xff]  ;;  %v288_v23 = vld [vmem:[%s1767_s25 + $0x70] sm:$0xff]  ;;  %v289_v24 = vld [vmem:[%s1767_s25 + $0x78] sm:$0xff]  ;;  %v349_v25 = vadd.f32 %v293_v19, %v292_v18  ;;  %264 = vst.msk [vmem:[#allocation2 + $0x30] sm:$0xff] %vm257_vm0, %v1710_v21 }
  0x15   : > { %v346_v26 = vadd.f32 %v291_v22, %v290_v20  ;;  %v343_v27 = vadd.f32 %v289_v24, %v288_v23  ;;  %v286_v28 = vld [vmem:[%s1767_s25 + $0x60] sm:$0xff]  ;;  %v287_v29 = vld [vmem:[%s1767_s25 + $0x68] sm:$0xff]  ;;  %v284_v30 = vld [vmem:[%s1767_s25 + $0x50] sm:$0xff]  ;;  %265 = vst.msk [vmem:[#allocation2 + $0x38] sm:$0xff] %vm257_vm0, %v1710_v21 }
  0x16   : > { %v285_v31 = vld [vmem:[%s1767_s25 + $0x58] sm:$0xff]  ;;  %v282_v32 = vld [vmem:[%s1767_s25 + $0x40] sm:$0xff]  ;;  %v283_v33 = vld [vmem:[%s1767_s25 + $0x48] sm:$0xff]  ;;  %266 = vst.msk [vmem:[#allocation2 + $0x40] sm:$0xff] %vm257_vm0, %v1710_v21  ;;  %v340_v34 = vadd.f32 %v287_v29, %v286_v28 }
  0x17   : > { %267 = vst.msk [vmem:[#allocation2 + $0x48] sm:$0xff] %vm257_vm0, %v1710_v21  ;;  %v337_v35 = vadd.f32 %v285_v31, %v284_v30  ;;  %v334_v36 = vadd.f32 %v283_v33, %v282_v32  ;;  %v280_v37 = vld [vmem:[%s1767_s25 + $0x30] sm:$0xff]  ;;  %v281_v38 = vld [vmem:[%s1767_s25 + $0x38] sm:$0xff]  ;;  %v278_v39 = vld [vmem:[%s1767_s25 + $0x20] sm:$0xff] }
  0x18   : > { %268 = vst.msk [vmem:[#allocation2 + $0x50] sm:$0xff] %vm257_vm0, %v1710_v21  ;;  %v279_v40 = vld [vmem:[%s1767_s25 + $0x28] sm:$0xff]  ;;  %v276_v41 = vld [vmem:[%s1767_s25 + $0x10] sm:$0xff]  ;;  %v277_v42 = vld [vmem:[%s1767_s25 + $0x18] sm:$0xff]  ;;  %v331_v43 = vadd.f32 %v281_v38, %v280_v37 }
  0x19   : > { %269 = vst.msk [vmem:[#allocation2 + $0x58] sm:$0xff] %vm257_vm0, %v1710_v21  ;;  %v328_v44 = vadd.f32 %v279_v40, %v278_v39  ;;  %v325_v45 = vadd.f32 %v277_v42, %v276_v41  ;;  %v274_v46 = vld [vmem:[%s1767_s25] sm:$0xff]  ;;  %v275_v47 = vld [vmem:[%s1767_s25 + $0x8] sm:$0xff]  ;;  %v321_v49 = vld [vmem:[#allocation2 + $0x78] sm:$0xff] }
  0x1a   : > { %365 = vadd.xlane.f32.xlu0 %v364_v15  ;;  %270 = vst.msk [vmem:[#allocation2 + $0x60] sm:$0xff] %vm257_vm0, %v1710_v21  ;;  %v322_v48 = vadd.f32 %v275_v47, %v274_v46  ;;  %v311_v22 = vld [vmem:[#allocation2 + $0x28] sm:$0xff]  ;;  %v310_v23 = vld [vmem:[#allocation2 + $0x20] sm:$0xff]  ;;  %v309_v38 = vld [vmem:[#allocation2 + $0x18] sm:$0xff] }
  0x1b   : > { %359 = vadd.xlane.f32.xlu1 %v358_v16  ;;  %271 = vst.msk [vmem:[#allocation2 + $0x68] sm:$0xff] %vm257_vm0, %v1710_v21  ;;  %v312_v20 = vld [vmem:[#allocation2 + $0x30] sm:$0xff]  ;;  %v307_v41 = vld [vmem:[#allocation2 + $0x8] sm:$0xff] }
  0x1c   : > { %353 = vadd.xlane.f32.xlu2 %v352_v17  ;;  %272 = vst.msk [vmem:[#allocation2 + $0x70] sm:$0xff] %vm257_vm0, %v1710_v21  ;;  %v313_v7 = vld [vmem:[#allocation2 + $0x38] sm:$0xff]  ;;  %v308_v40 = vld [vmem:[#allocation2 + $0x10] sm:$0xff] }
  0x1d   : > { %v314_v6 = vld [vmem:[#allocation2 + $0x40] sm:$0xff] }
  0x1e   : > { %v315_v5 = vld [vmem:[#allocation2 + $0x48] sm:$0xff] }
  0x1f   : > { %v316_v60 = vld [vmem:[#allocation2 + $0x50] sm:$0xff] }
  0x20   : > { %v317_v51 = vld [vmem:[#allocation2 + $0x58] sm:$0xff] }
  0x21   : > { %v318_v59 = vld [vmem:[#allocation2 + $0x60] sm:$0xff] }
  0x22   : > { %350 = vadd.xlane.f32.xlu0 %v349_v25  ;;  %v319_v50 = vld [vmem:[#allocation2 + $0x68] sm:$0xff] }
  0x23   : > { %347 = vadd.xlane.f32.xlu1 %v346_v26  ;;  %v320_v58 = vld [vmem:[#allocation2 + $0x70] sm:$0xff] }
  0x24   : > { %344 = vadd.xlane.f32.xlu2 %v343_v27 }
  0x2a   : > { %341 = vadd.xlane.f32.xlu0 %v340_v34 }
  0x2b   : > { %338 = vadd.xlane.f32.xlu1 %v337_v35 }
  0x2c   : > { %335 = vadd.xlane.f32.xlu2 %v334_v36 }
  0x32   : > { %332 = vadd.xlane.f32.xlu0 %v331_v43 }
  0x33   : > { %329 = vadd.xlane.f32.xlu1 %v328_v44 }
  0x34   : > { %326 = vadd.xlane.f32.xlu2 %v325_v45 }
  0x3a   : > { %323 = vadd.xlane.f32.xlu0 %v322_v48 }
  0x85   : > { %v369_v52 = vpop.xlane.xlu0 %368 }
  0x86   : > { %v385_v53 = vadd.f32 %v369_v52, %v321_v49  ;;  %v363_v54 = vpop.xlane.xlu1 %362 }
  0x87   : > { %v357_v55 = vpop.xlane.xlu2 %356  ;;  %v383_v56 = vadd.f32 %v363_v54, %v319_v50  ;;  %v306_v54 = vld [vmem:[#allocation2] sm:$0xff] }
  0x88   : > { %v381_v57 = vadd.f32 %v357_v55, %v317_v51  ;;  %402 = vst.msk [vmem:[#allocation2 + $0x78] sm:$0xff] %vm257_vm0, %v385_v53 }
  0x89   : > { %400 = vst.msk [vmem:[#allocation2 + $0x68] sm:$0xff] %vm257_vm0, %v383_v56 }
  0x8a   : > { %398 = vst.msk [vmem:[#allocation2 + $0x58] sm:$0xff] %vm257_vm0, %v381_v57 }
  0x8d   : > { %v366_v61 = vpop.xlane.xlu0 %365 }
  0x8e   : > { %v384_v62 = vadd.f32 %v366_v61, %v320_v58  ;;  %v360_v63 = vpop.xlane.xlu1 %359 }
  0x8f   : > { %v354_v0 = vpop.xlane.xlu2 %353  ;;  %v382_v1 = vadd.f32 %v360_v63, %v318_v59  ;;  %v421_v2 = vld [vmem:[#allocation2 + $0x78] sm:$0xff] }
  0x90   : > { %v380_v3 = vadd.f32 %v354_v0, %v316_v60  ;;  %401 = vst.msk [vmem:[#allocation2 + $0x70] sm:$0xff] %vm257_vm0, %v384_v62  ;;  %v437_v4 = vmul.f32 0.00390625, %v421_v2  ;;  %v419_v15 = vld [vmem:[#allocation2 + $0x68] sm:$0xff] }
  0x91   : > { %399 = vst.msk [vmem:[#allocation2 + $0x60] sm:$0xff] %vm257_vm0, %v382_v1  ;;  %v435_v18 = vmul.f32 0.00390625, %v419_v15  ;;  %v417_v21 = vld [vmem:[#allocation2 + $0x58] sm:$0xff]  ;;  %v438_v1 = vld [vmem:[%s2576_s1] sm:$0xff]  ;;  %v439_v2 = vld [vmem:[%s2576_s1 + $0x8] sm:$0xff] }
  0x92   : > { %442 = vmatpush.msra.mxu0 %v437_v4  ;;  %397 = vst.msk [vmem:[#allocation2 + $0x50] sm:$0xff] %vm257_vm0, %v380_v3  ;;  %v433_v27 = vmul.f32 0.00390625, %v417_v21  ;;  %v440_v4 = vld [vmem:[%s2577_s2] sm:$0xff]  ;;  %v480_v15 = vld [vmem:[%s2578_s3 + $0x68] sm:$0xff]  ;;  %v482_v21 = vld [vmem:[%s2578_s3 + $0x78] sm:$0xff] }
  0x95   : > { %v351_v8 = vpop.xlane.xlu0 %350 }
  0x96   : > { %v379_v9 = vadd.f32 %v351_v8, %v315_v5  ;;  %v348_v10 = vpop.xlane.xlu1 %347  ;;  %v441_v5 = vld [vmem:[%s2577_s2 + $0x8] sm:$0xff] }
  0x97   : > { %v345_v11 = vpop.xlane.xlu2 %344  ;;  %v378_v12 = vadd.f32 %v348_v10, %v314_v6  ;;  %v420_v13 = vld [vmem:[#allocation2 + $0x70] sm:$0xff] }
  0x98   : > { %v377_v14 = vadd.f32 %v345_v11, %v313_v7  ;;  %396 = vst.msk [vmem:[#allocation2 + $0x48] sm:$0xff] %vm257_vm0, %v379_v9  ;;  %v436_v16 = vmul.f32 0.00390625, %v420_v13  ;;  %v418_v17 = vld [vmem:[#allocation2 + $0x60] sm:$0xff]  ;;  %v469_v11 = vld [vmem:[%s2578_s3 + $0x10] sm:$0xff] }
  0x99   : > { %395 = vst.msk [vmem:[#allocation2 + $0x40] sm:$0xff] %vm257_vm0, %v378_v12  ;;  %v434_v19 = vmul.f32 0.00390625, %v418_v17  ;;  %v416_v25 = vld [vmem:[#allocation2 + $0x50] sm:$0xff]  ;;  %v479_v12 = vld [vmem:[%s2578_s3 + $0x60] sm:$0xff] }
  0x9a   : > { %443 = vmatpush.msra.mxu0 %v436_v16  ;;  %394 = vst.msk [vmem:[#allocation2 + $0x38] sm:$0xff] %vm257_vm0, %v377_v14  ;;  %v432_v33 = vmul.f32 0.00390625, %v416_v25  ;;  %v489_v13 = vld [vmem:[%s2578_s3 + $0xb0] sm:$0xff]  ;;  %v470_v14 = vld [vmem:[%s2578_s3 + $0x18] sm:$0xff]  ;;  %v471_v17 = vld [vmem:[%s2578_s3 + $0x20] sm:$0xff] }
  0x9b   : > { %v490_v16 = vld [vmem:[%s2578_s3 + $0xb8] sm:$0xff]  ;;  %v483_v25 = vld [vmem:[%s2578_s3 + $0x80] sm:$0xff] }
  0x9c   : > { %444 = vmatpush.msra.mxu0 %v435_v18  ;;  %v481_v18 = vld [vmem:[%s2578_s3 + $0x70] sm:$0xff] }
  0x9d   : > { %v342_v24 = vpop.xlane.xlu0 %341 }
  0x9e   : > { %v376_v26 = vadd.f32 %v342_v24, %v312_v20  ;;  %445 = vmatpush.msra.mxu0 %v434_v19  ;;  %v339_v28 = vpop.xlane.xlu1 %338  ;;  %v491_v19 = vld [vmem:[%s2578_s3 + $0xc0] sm:$0xff]  ;;  %v472_v20 = vld [vmem:[%s2578_s3 + $0x28] sm:$0xff]  ;;  %v473_v24 = vld [vmem:[%s2578_s3 + $0x30] sm:$0xff] }
  0x9f   : > { %v336_v29 = vpop.xlane.xlu2 %335  ;;  %v375_v30 = vadd.f32 %v339_v28, %v311_v22  ;;  %v415_v32 = vld [vmem:[#allocation2 + $0x48] sm:$0xff]  ;;  %v474_v28 = vld [vmem:[%s2578_s3 + $0x38] sm:$0xff] }
  0xa0   : > { %v374_v31 = vadd.f32 %v336_v29, %v310_v23  ;;  %393 = vst.msk [vmem:[#allocation2 + $0x30] sm:$0xff] %vm257_vm0, %v376_v26  ;;  %446 = vmatpush.msra.mxu0 %v433_v27  ;;  %v414_v34 = vld [vmem:[#allocation2 + $0x40] sm:$0xff]  ;;  %v431_v36 = vmul.f32 0.00390625, %v415_v32  ;;  %v492_v22 = vld [vmem:[%s2578_s3 + $0xc8] sm:$0xff]  ;;  %v493_v26 = vld [vmem:[%s2578_s3 + $0xd0] sm:$0xff] }
  0xa1   : > { %392 = vst.msk [vmem:[#allocation2 + $0x28] sm:$0xff] %vm257_vm0, %v375_v30  ;;  %v413_v35 = vld [vmem:[#allocation2 + $0x38] sm:$0xff]  ;;  %v430_v37 = vmul.f32 0.00390625, %v414_v34  ;;  %v467_v23 = vld [vmem:[%s2578_s3] sm:$0xff]  ;;  %v468_v27 = vld [vmem:[%s2578_s3 + $0x8] sm:$0xff] }
  0xa2   : > { %447 = vmatpush.msra.mxu0 %v432_v33  ;;  %391 = vst.msk [vmem:[#allocation2 + $0x20] sm:$0xff] %vm257_vm0, %v374_v31  ;;  %v429_v39 = vmul.f32 0.00390625, %v413_v35  ;;  %v484_v29 = vld [vmem:[%s2578_s3 + $0x88] sm:$0xff]  ;;  %v494_v30 = vld [vmem:[%s2578_s3 + $0xd8] sm:$0xff]  ;;  %v475_v31 = vld [vmem:[%s2578_s3 + $0x40] sm:$0xff] }
  0xa3   : > { %v485_v32 = vld [vmem:[%s2578_s3 + $0x90] sm:$0xff]  ;;  %v495_v33 = vld [vmem:[%s2578_s3 + $0xe0] sm:$0xff]  ;;  %v476_v34 = vld [vmem:[%s2578_s3 + $0x48] sm:$0xff] }
  0xa4   : > { %448 = vmatpush.msra.mxu0 %v431_v36  ;;  %v486_v35 = vld [vmem:[%s2578_s3 + $0x98] sm:$0xff]  ;;  %v496_v36 = vld [vmem:[%s2578_s3 + $0xe8] sm:$0xff] }
  0xa5   : > { %v333_v42 = vpop.xlane.xlu0 %332 }
  0xa6   : > { %v373_v43 = vadd.f32 %v333_v42, %v309_v38  ;;  %449 = vmatpush.msra.mxu0 %v430_v37  ;;  %v330_v44 = vpop.xlane.xlu1 %329  ;;  %v477_v37 = vld [vmem:[%s2578_s3 + $0x50] sm:$0xff]  ;;  %v487_v38 = vld [vmem:[%s2578_s3 + $0xa0] sm:$0xff]  ;;  %v498_v42 = vld [vmem:[%s2578_s3 + $0xf8] sm:$0xff] }
  0xa7   : > { %v327_v45 = vpop.xlane.xlu2 %326  ;;  %v372_v46 = vadd.f32 %v330_v44, %v308_v40  ;;  %v412_v47 = vld [vmem:[#allocation2 + $0x30] sm:$0xff]  ;;  %v478_v40 = vld [vmem:[%s2578_s3 + $0x58] sm:$0xff] }
  0xa8   : > { %v371_v48 = vadd.f32 %v327_v45, %v307_v41  ;;  %390 = vst.msk [vmem:[#allocation2 + $0x18] sm:$0xff] %vm257_vm0, %v373_v43  ;;  %450 = vmatpush.msra.mxu0 %v429_v39  ;;  %v428_v49 = vmul.f32 0.00390625, %v412_v47  ;;  %v411_v50 = vld [vmem:[#allocation2 + $0x28] sm:$0xff]  ;;  %v497_v39 = vld [vmem:[%s2578_s3 + $0xf0] sm:$0xff]  ;;  %v511_v47 = vld [vmem:[%s2579_s4 + $0x60] sm:$0xff] }
  0xa9   : > { %389 = vst.msk [vmem:[#allocation2 + $0x10] sm:$0xff] %vm257_vm0, %v372_v46  ;;  %v427_v51 = vmul.f32 0.00390625, %v411_v50  ;;  %v410_v52 = vld [vmem:[#allocation2 + $0x20] sm:$0xff]  ;;  %v488_v41 = vld [vmem:[%s2578_s3 + $0xa8] sm:$0xff]  ;;  %v501_v43 = vld [vmem:[%s2579_s4 + $0x10] sm:$0xff] }
  0xaa   : > { %451 = vmatpush.msra.mxu0 %v428_v49  ;;  %388 = vst.msk [vmem:[#allocation2 + $0x8] sm:$0xff] %vm257_vm0, %v371_v48  ;;  %v426_v53 = vmul.f32 0.00390625, %v410_v52  ;;  %v521_v48 = vld [vmem:[%s2579_s4 + $0xb0] sm:$0xff]  ;;  %v502_v50 = vld [vmem:[%s2579_s4 + $0x18] sm:$0xff] }
  0xac   : > { %452 = vmatpush.msra.mxu0 %v427_v51 }
  0xad   : > { %v324_v55 = vpop.xlane.xlu0 %323 }
  0xae   : > { %v370_v56 = vadd.f32 %v324_v55, %v306_v54  ;;  %453 = vmatpush.msra.mxu0 %v426_v53 }
  0xaf   : > { %v409_v57 = vld [vmem:[#allocation2 + $0x18] sm:$0xff] }
  0xb0   : > { %387 = vst.msk [vmem:[#allocation2] sm:$0xff] %vm257_vm0, %v370_v56  ;;  %v425_v58 = vmul.f32 0.00390625, %v409_v57  ;;  %v408_v59 = vld [vmem:[#allocation2 + $0x10] sm:$0xff] }
  0xb1   : > { %v424_v60 = vmul.f32 0.00390625, %v408_v59  ;;  %v407_v61 = vld [vmem:[#allocation2 + $0x8] sm:$0xff] }
  0xb2   : > { %454 = vmatpush.msra.mxu0 %v425_v58  ;;  %v423_v62 = vmul.f32 0.00390625, %v407_v61  ;;  %v512_v61 = vld [vmem:[%s2579_s4 + $0x68] sm:$0xff] }
  0xb4   : > { %455 = vmatpush.msra.mxu0 %v424_v60 }
  0xb6   : > { %456 = vmatpush.msra.mxu0 %v423_v62  ;;  %v522_v62 = vld [vmem:[%s2579_s4 + $0xb8] sm:$0xff] }
  0xb7   : > { %v406_v63 = vld [vmem:[#allocation2] sm:$0xff] }
  0xb8   : > { %v422_v0 = vmul.f32 0.00390625, %v406_v63 }
  0xba   : > { %457 = vmatpush.msra.mxu0 %v422_v0  ;;  %v503_v0 = vld [vmem:[%s2579_s4 + $0x20] sm:$0xff] }
  0xbb   : > { %458 = vmatmul.f32.vlgmr.msra.gmra.mxu0 %v438_v1 }
  0xc3   : > { %461 = vmatmul.f32.gmra.mxu0 %v439_v2 }
 0x138   : > { %v459_v3 = vpop.f32.mrf.mxu0 }
 0x139   : > { %v460_v7 = vadd.f32 %v459_v3, %v440_v4 }
 0x13b   : > { %v465_v10 = vmax.f32 %v460_v7, 0.0 }
 0x140   : > { %v462_v6 = vpop.f32.mrf.mxu0 }
 0x141   : > { %v463_v8 = vadd.f32 %v462_v6, %v441_v5 }
 0x143   : > { %v466_v9 = vmax.f32 %v463_v8, 0.0 }
 0x145   : > { %642 = vmatpush.msrb.mxu0 %v466_v9  ;;  %1527 = vmatpush.msra.mxu1 %v466_v9 }
 0x146   : > { %1528 = vmatpush.msra.mxu2 %v466_v9  ;;  %1529 = vmatpush.msra.mxu3 %v466_v9 }
 0x147   : > { %643 = vmatpush.msrb.mxu0 %v465_v10  ;;  %1530 = vmatpush.msra.mxu1 %v465_v10 }
 0x148   : > { %1531 = vmatpush.msra.mxu2 %v465_v10  ;;  %1532 = vmatpush.msra.mxu3 %v465_v10 }
 0x149   : > { %1461 = vmatmul.msk.f32.vlgmr.msra.gmra.mxu1 %vm531_vm1, %v469_v11  ;;  %1471 = vmatmul.msk.f32.vlgmr.msra.gmra.mxu2 %vm531_vm1, %v479_v12 }
 0x14a   : > { %1481 = vmatmul.msk.f32.vlgmr.msra.gmra.mxu3 %vm531_vm1, %v489_v13  ;;  %1459 = vmatmul.msk.f32.vlgmr.msrb.gmra.mxu0 %vm531_vm1, %v467_v23 }
 0x151   : > { %1462 = vmatmul.msk.f32.gmra.mxu1 %vm531_vm1, %v470_v14  ;;  %1472 = vmatmul.msk.f32.gmra.mxu2 %vm531_vm1, %v480_v15 }
 0x152   : > { %1482 = vmatmul.msk.f32.gmra.mxu3 %vm531_vm1, %v490_v16  ;;  %1460 = vmatmul.msk.f32.gmra.mxu0 %vm531_vm1, %v468_v27  ;;  %v513_v16 = vld [vmem:[%s2579_s4 + $0x70] sm:$0xff] }
 0x159   : > { %1463 = vmatmul.msk.f32.gmra.mxu1 %vm531_vm1, %v471_v17  ;;  %1473 = vmatmul.msk.f32.gmra.mxu2 %vm531_vm1, %v481_v18 }
 0x15a   : > { %1483 = vmatmul.msk.f32.gmra.mxu3 %vm531_vm1, %v491_v19 }
 0x161   : > { %1464 = vmatmul.msk.f32.gmra.mxu1 %vm531_vm1, %v472_v20  ;;  %1474 = vmatmul.msk.f32.gmra.mxu2 %vm531_vm1, %v482_v21 }
 0x162   : > { %1484 = vmatmul.msk.f32.gmra.mxu3 %vm531_vm1, %v492_v22 }
 0x169   : > { %1465 = vmatmul.msk.f32.gmra.mxu1 %vm531_vm1, %v473_v24  ;;  %1475 = vmatmul.msk.f32.gmra.mxu2 %vm531_vm1, %v483_v25  ;;  %v523_v25 = vld [vmem:[%s2579_s4 + $0xc0] sm:$0xff] }
 0x16a   : > { %1485 = vmatmul.msk.f32.gmra.mxu3 %vm531_vm1, %v493_v26 }
 0x171   : > { %1466 = vmatmul.msk.f32.gmra.mxu1 %vm531_vm1, %v474_v28  ;;  %1476 = vmatmul.msk.f32.gmra.mxu2 %vm531_vm1, %v484_v29 }
 0x172   : > { %1486 = vmatmul.msk.f32.gmra.mxu3 %vm531_vm1, %v494_v30 }
 0x179   : > { %1467 = vmatmul.msk.f32.gmra.mxu1 %vm531_vm1, %v475_v31  ;;  %1477 = vmatmul.msk.f32.gmra.mxu2 %vm531_vm1, %v485_v32 }
 0x17a   : > { %1487 = vmatmul.msk.f32.gmra.mxu3 %vm531_vm1, %v495_v33 }
 0x181   : > { %1468 = vmatmul.msk.f32.gmra.mxu1 %vm531_vm1, %v476_v34  ;;  %1478 = vmatmul.msk.f32.gmra.mxu2 %vm531_vm1, %v486_v35 }
 0x182   : > { %1488 = vmatmul.msk.f32.gmra.mxu3 %vm531_vm1, %v496_v36 }
 0x189   : > { %1469 = vmatmul.msk.f32.gmra.mxu1 %vm531_vm1, %v477_v37  ;;  %1479 = vmatmul.msk.f32.gmra.mxu2 %vm531_vm1, %v487_v38 }
 0x18a   : > { %1489 = vmatmul.msk.f32.gmra.mxu3 %vm531_vm1, %v497_v39 }
 0x191   : > { %1470 = vmatmul.msk.f32.gmra.mxu1 %vm531_vm1, %v478_v40  ;;  %1480 = vmatmul.msk.f32.gmra.mxu2 %vm531_vm1, %v488_v41 }
 0x192   : > { %1490 = vmatmul.msk.f32.gmra.mxu3 %vm531_vm1, %v498_v42 }
 0x1c6   : > { %v651_v44 = vpop.f32.mrf.mxu1 }
 0x1c7   : > { %v652_v45 = vadd.f32 %v651_v44, %v501_v43 }
 0x1c9   : > { %v1493_v46 = vmul.f32 -1.442695, %v652_v45 }
 0x1cb   : > { %1558 = vpow2.f32 %v1493_v46 }
 0x1cc   : > { %v681_v49 = vpop.f32.mrf.mxu2 }
 0x1cd   : > { %v682_v51 = vadd.f32 %v681_v49, %v511_v47  ;;  %v711_v52 = vpop.f32.mrf.mxu3 }
 0x1ce   : > { %v712_v53 = vadd.f32 %v711_v52, %v521_v48  ;;  %v654_v54 = vpop.f32.mrf.mxu1 }
 0x1cf   : > { %v1503_v55 = vmul.f32 -1.442695, %v682_v51  ;;  %v655_v56 = vadd.f32 %v654_v54, %v502_v50 }
 0x1d0   : > { %v1513_v57 = vmul.f32 -1.442695, %v712_v53 }
 0x1d1   : > { %v1559_v58 = vpop.eup %1558  ;;  %1560 = vpow2.f32 %v1503_v55  ;;  %v1494_v59 = vmul.f32 -1.442695, %v655_v56 }
 0x1d2   : > { %v839_v60 = vadd.f32 1.0, %v1559_v58  ;;  %1562 = vpow2.f32 %v1513_v57 }
 0x1d3   : > { %1564 = vpow2.f32 %v1494_v59 }
 0x1d4   : > { %1566 = vrcp.f32 %v839_v60  ;;  %v684_v63 = vpop.f32.mrf.mxu2  ;;  %v908_v14 = vand.u32 2147483647, %v839_v60  ;;  %v910_v18 = vand.u32 2147483648, %v839_v60  ;;  %vm904_vm2 = vweird.f32 %v839_v60 }
 0x1d5   : > { %v685_v1 = vadd.f32 %v684_v63, %v512_v61  ;;  %v714_v2 = vpop.f32.mrf.mxu3 }
 0x1d6   : > { %v715_v3 = vadd.f32 %v714_v2, %v522_v62  ;;  %v657_v4 = vpop.f32.mrf.mxu1  ;;  %vm2010_vm3 = vcmp.eq.f32.partialorder %v908_v14, 8.507059e+37  ;;  %v911_v32 = vor.u32 1.1754944e-38, %v910_v18  ;;  %v504_v14 = vld [vmem:[%s2579_s4 + $0x28] sm:$0xff] }
 0x1d7   : > { %v1561_v5 = vpop.eup %1560  ;;  %v1504_v6 = vmul.f32 -1.442695, %v685_v1  ;;  %v658_v7 = vadd.f32 %v657_v4, %v503_v0 }
 0x1d8   : > { %v1563_v8 = vpop.eup %1562  ;;  %v1994_v9 = vadd.f32 1.0, %v1561_v5  ;;  %v1514_v12 = vmul.f32 -1.442695, %v715_v3 }
 0x1d9   : > { %v1565_v10 = vpop.eup %1564  ;;  %v1996_v11 = vadd.f32 1.0, %v1563_v8  ;;  %1568 = vpow2.f32 %v1504_v6  ;;  %v1495_v15 = vmul.f32 -1.442695, %v658_v7 }
 0x1da   : > { %v1567_v13 = vpop.eup %1566  ;;  %1570 = vrcp.f32 %v1994_v9  ;;  %v1058_v19 = vand.u32 2147483647, %v1994_v9  ;;  %v1060_v20 = vand.u32 2147483648, %v1994_v9  ;;  %v2005_v23 = vadd.f32 1.0, %v1565_v10 }
 0x1db   : > { %v900_v17 = vmul.f32 %v1567_v13, %v839_v60  ;;  %1572 = vrcp.f32 %v1996_v11  ;;  %v1208_v28 = vand.u32 2147483647, %v1996_v11  ;;  %v1210_v29 = vand.u32 2147483648, %v1996_v11 }
 0x1dc   : > { %v687_v21 = vpop.f32.mrf.mxu2  ;;  %1574 = vpow2.f32 %v1514_v12  ;;  %vm905_vm4 = vweird.f32 %v1567_v13  ;;  %vm1054_vm5 = vweird.f32 %v1994_v9  ;;  %vm1204_vm6 = vweird.f32 %v1996_v11 }
 0x1dd   : > { %v901_v22 = vsub.f32 1.0, %v900_v17  ;;  %v688_v24 = vadd.f32 %v687_v21, %v513_v16  ;;  %v717_v26 = vpop.f32.mrf.mxu3  ;;  %1576 = vpow2.f32 %v1495_v15  ;;  %vm2022_vm7 = vcmp.eq.f32.partialorder %v1058_v19, 8.507059e+37  ;;  %vm906_vm8 = vmor %vm904_vm2, %vm905_vm4  ;;  %v514_v19 = vld [vmem:[%s2579_s4 + $0x78] sm:$0xff] }
 0x1de   : > { %1578 = vrcp.f32 %v2005_v23  ;;  %v718_v35 = vadd.f32 %v717_v26, %v523_v25  ;;  %v1061_v40 = vor.u32 1.1754944e-38, %v1060_v20  ;;  %vm2036_vm9 = vcmp.eq.f32.partialorder %v1208_v28, 8.507059e+37  ;;  %v660_v0 = vpop.f32.mrf.mxu1  ;;  %v506_v17 = vld [vmem:[%s2579_s4 + $0x38] sm:$0xff] }
 0x1df   : > { %v1569_v30 = vpop.eup %1568  ;;  %v902_v31 = vmul.f32 %v1567_v13, %v901_v22  ;;  %v1505_v41 = vmul.f32 -1.442695, %v688_v24  ;;  %v1211_v44 = vor.u32 1.1754944e-38, %v1210_v29  ;;  %v923_v45 = vand.u32 2147483647, %v2005_v23 }
 0x1e0   : > { %v1571_v33 = vpop.eup %1570  ;;  %v2019_v34 = vadd.f32 1.0, %v1569_v30  ;;  %vm919_vm10 = vweird.f32 %v2005_v23  ;;  %v925_v49 = vand.u32 2147483648, %v2005_v23  ;;  %v1515_v54 = vmul.f32 -1.442695, %v718_v35 }
 0x1e1   : > { %v1573_v36 = vpop.eup %1572  ;;  %v903_v37 = vadd.f32 %v1567_v13, %v902_v31  ;;  %v1050_v38 = vmul.f32 %v1571_v33, %v1994_v9  ;;  %vm1055_vm11 = vweird.f32 %v1571_v33  ;;  %vm2053_vm13 = vcmp.eq.f32.partialorder %v923_v45, 8.507059e+37 }
 0x1e2   : > { %v1200_v42 = vmul.f32 %v1573_v36, %v1996_v11  ;;  %1580 = vrcp.f32 %v2019_v34  ;;  %v1575_v46 = vpop.eup %1574  ;;  %vm1205_vm12 = vweird.f32 %v1573_v36  ;;  %v926_v62 = vor.u32 1.1754944e-38, %v925_v49  ;;  %vm1056_vm14 = vmor %vm1054_vm5, %vm1055_vm11 }
 0x1e3   : > { %v907_v47 = vsel %vm906_vm8, %v1567_v13, %v903_v37  ;;  %v1051_v48 = vsub.f32 1.0, %v1050_v38  ;;  %v1577_v50 = vpop.eup %1576  ;;  %v2046_v53 = vadd.f32 1.0, %v1575_v46  ;;  %1582 = vpow2.f32 %v1505_v41  ;;  %vm1206_vm15 = vmor %vm1204_vm6, %vm1205_vm12 }
 0x1e4   : > { %v912_v51 = vsel %vm2010_vm3, %v911_v32, %v907_v47  ;;  %v1201_v52 = vsub.f32 1.0, %v1200_v42  ;;  %v1579_v55 = vpop.eup %1578  ;;  %v2050_v57 = vadd.f32 1.0, %v1577_v50  ;;  %v1073_v63 = vand.u32 2147483647, %v2019_v34  ;;  %v690_v1 = vpop.f32.mrf.mxu2  ;;  %v524_v42 = vld [vmem:[%s2579_s4 + $0xc8] sm:$0xff] }
 0x1e5   : > { %1351 = vst.msk [vmem:[%s2031_s13 + $0x10] sm:$0xff] %vm257_vm0, %v912_v51  ;;  %v1052_v56 = vmul.f32 %v1571_v33, %v1051_v48  ;;  %v915_v59 = vmul.f32 %v1579_v55, %v2005_v23  ;;  %1584 = vrcp.f32 %v2046_v53  ;;  %v1075_v5 = vand.u32 2147483648, %v2019_v34  ;;  %v2063_v6 = vpop.f32.mrf.mxu3 }
 0x1e6   : > { %v1202_v58 = vmul.f32 %v1573_v36, %v1201_v52  ;;  %1586 = vrcp.f32 %v2050_v57  ;;  %vm920_vm1 = vweird.f32 %v1579_v55  ;;  %vm1069_vm2 = vweird.f32 %v2019_v34  ;;  %v663_v43 = vpop.f32.mrf.mxu1 }
 0x1e7   : > { %v1053_v61 = vadd.f32 %v1571_v33, %v1052_v56  ;;  %v916_v4 = vsub.f32 1.0, %v915_v59  ;;  %v1223_v13 = vand.u32 2147483647, %v2046_v53  ;;  %vm2080_vm3 = vcmp.eq.f32.partialorder %v1073_v63, 8.507059e+37  ;;  %vm921_vm4 = vmor %vm919_vm10, %vm920_vm1 }
 0x1e8   : > { %v1581_v2 = vpop.eup %1580  ;;  %v1203_v3 = vadd.f32 %v1573_v36, %v1202_v58  ;;  %v1225_v18 = vand.u32 2147483648, %v2046_v53  ;;  %v1076_v21 = vor.u32 1.1754944e-38, %v1075_v5  ;;  %1588 = vpow2.f32 %v1515_v54 }
 0x1e9   : > { %v1057_v7 = vsel %vm1056_vm14, %v1571_v33, %v1053_v61  ;;  %v1065_v8 = vmul.f32 %v1581_v2, %v2019_v34  ;;  %v917_v12 = vmul.f32 %v1579_v55, %v916_v4  ;;  %v1583_v15 = vpop.eup %1582  ;;  %vm1070_vm5 = vweird.f32 %v1581_v2  ;;  %v505_v34 = vld [vmem:[%s2579_s4 + $0x30] sm:$0xff] }
 0x1ea   : > { %v1062_v9 = vsel %vm2022_vm7, %v1061_v40, %v1057_v7  ;;  %v1207_v10 = vsel %vm1206_vm15, %v1573_v36, %v1203_v3  ;;  %v2090_v22 = vadd.f32 1.0, %v1583_v15  ;;  %vm1219_vm6 = vweird.f32 %v2046_v53  ;;  %vm1071_vm8 = vmor %vm1069_vm2, %vm1070_vm5  ;;  %v515_v3 = vld [vmem:[%s2579_s4 + $0x80] sm:$0xff] }
 0x1eb   : > { %1361 = vst.msk [vmem:[%s2031_s13 + $0x60] sm:$0xff] %vm257_vm0, %v1062_v9  ;;  %v1212_v11 = vsel %vm2036_vm9, %v1211_v44, %v1207_v10  ;;  %v1066_v16 = vsub.f32 1.0, %v1065_v8  ;;  %v918_v20 = vadd.f32 %v1579_v55, %v917_v12  ;;  %v1585_v24 = vpop.eup %1584  ;;  %v661_v26 = vadd.f32 %v660_v0, %v504_v14 }
 0x1ec   : > { %1371 = vst.msk [vmem:[%s2031_s13 + $0xb0] sm:$0xff] %vm257_vm0, %v1212_v11  ;;  %v1587_v27 = vpop.eup %1586  ;;  %v1215_v29 = vmul.f32 %v1585_v24, %v2046_v53  ;;  %vm2097_vm7 = vcmp.eq.f32.partialorder %v1223_v13, 8.507059e+37  ;;  %v691_v31 = vadd.f32 %v690_v1, %v514_v19  ;;  %v1226_v23 = vor.u32 1.1754944e-38, %v1225_v18  ;;  %v693_v44 = vpop.f32.mrf.mxu2  ;;  %v525_v13 = vld [vmem:[%s2579_s4 + $0xd0] sm:$0xff]  ;;  %v516_v19 = vld [vmem:[%s2579_s4 + $0x88] sm:$0xff] }
 0x1ed   : > { %v1067_v25 = vmul.f32 %v1581_v2, %v1066_v16  ;;  %v922_v28 = vsel %vm921_vm4, %v1579_v55, %v918_v20  ;;  %v930_v35 = vmul.f32 %v1587_v27, %v2050_v57  ;;  %vm934_vm9 = vweird.f32 %v2050_v57  ;;  %v723_v49 = vpop.f32.mrf.mxu3 }
 0x1ee   : > { %v927_v32 = vsel %vm2053_vm13, %v926_v62, %v922_v28  ;;  %v1216_v36 = vsub.f32 1.0, %v1215_v29  ;;  %v938_v37 = vand.u32 2147483647, %v2050_v57  ;;  %1590 = vrcp.f32 %v2090_v22  ;;  %v1589_v45 = vpop.eup %1588  ;;  %v666_v18 = vpop.f32.mrf.mxu1 }
 0x1ef   : > { %v1068_v33 = vadd.f32 %v1581_v2, %v1067_v25  ;;  %1352 = vst.msk [vmem:[%s2031_s13 + $0x18] sm:$0xff] %vm257_vm0, %v927_v32  ;;  %v931_v39 = vsub.f32 1.0, %v930_v35  ;;  %v940_v40 = vand.u32 2147483648, %v2050_v57  ;;  %v1496_v41 = vmul.f32 -1.442695, %v661_v26  ;;  %v526_v25 = vld [vmem:[%s2579_s4 + $0xd8] sm:$0xff] }
 0x1f0   : > { %v1217_v47 = vmul.f32 %v1585_v24, %v1216_v36  ;;  %vm1220_vm10 = vweird.f32 %v1585_v24  ;;  %v1506_v48 = vmul.f32 -1.442695, %v691_v31  ;;  %vm935_vm11 = vweird.f32 %v1587_v27 }
 0x1f1   : > { %v1072_v38 = vsel %vm1071_vm8, %v1581_v2, %v1068_v33  ;;  %v932_v50 = vmul.f32 %v1587_v27, %v931_v39  ;;  %v2122_v51 = vadd.f32 1.0, %v1589_v45  ;;  %1592 = vpow2.f32 %v1496_v41  ;;  %vm1221_vm12 = vmor %vm1219_vm6, %vm1220_vm10 }
 0x1f2   : > { %v1077_v46 = vsel %vm2080_vm3, %v1076_v21, %v1072_v38  ;;  %v1218_v52 = vadd.f32 %v1585_v24, %v1217_v47  ;;  %1594 = vpow2.f32 %v1506_v48  ;;  %v721_v54 = vadd.f32 %v2063_v6, %v524_v42  ;;  %vm936_vm14 = vmor %vm934_vm9, %vm935_vm11 }
 0x1f3   : > { %1362 = vst.msk [vmem:[%s2031_s13 + $0x68] sm:$0xff] %vm257_vm0, %v1077_v46  ;;  %v664_v55 = vadd.f32 %v663_v43, %v505_v34  ;;  %v933_v56 = vadd.f32 %v1587_v27, %v932_v50  ;;  %vm939_vm13 = vcmp.eq.f32.partialorder %v938_v37, 8.507059e+37  ;;  %v941_v58 = vor.u32 1.1754944e-38, %v940_v40 }
 0x1f4   : > { %1596 = vrcp.f32 %v2122_v51  ;;  %v1591_v59 = vpop.eup %1590  ;;  %v1222_v60 = vsel %vm1221_vm12, %v1585_v24, %v1218_v52  ;;  %v1088_v61 = vand.u32 2147483647, %v2090_v22  ;;  %v1516_v62 = vmul.f32 -1.442695, %v721_v54  ;;  %v696_v20 = vpop.f32.mrf.mxu2 }
 0x1f5   : > { %v1497_v63 = vmul.f32 -1.442695, %v664_v55  ;;  %v1227_v53 = vsel %vm2097_vm7, %v1226_v23, %v1222_v60  ;;  %v937_v0 = vsel %vm936_vm14, %v1587_v27, %v933_v56  ;;  %v1080_v1 = vmul.f32 %v1591_v59, %v2090_v22  ;;  %v726_v26 = vpop.f32.mrf.mxu3 }
 0x1f6   : > { %v1090_v2 = vand.u32 2147483648, %v2090_v22  ;;  %1372 = vst.msk [vmem:[%s2031_s13 + $0xb8] sm:$0xff] %vm257_vm0, %v1227_v53  ;;  %v942_v57 = vsel %vm939_vm13, %v941_v58, %v937_v0  ;;  %v1238_v4 = vand.u32 2147483647, %v2122_v51  ;;  %1598 = vpow2.f32 %v1516_v62 }
 0x1f7   : > { %v1593_v5 = vpop.eup %1592  ;;  %1353 = vst.msk [vmem:[%s2031_s13 + $0x20] sm:$0xff] %vm257_vm0, %v942_v57  ;;  %v1081_v6 = vsub.f32 1.0, %v1080_v1  ;;  %v1240_v7 = vand.u32 2147483648, %v2122_v51  ;;  %1600 = vpow2.f32 %v1497_v63  ;;  %vm1084_vm15 = vweird.f32 %v2090_v22 }
 0x1f8   : > { %v1595_v8 = vpop.eup %1594  ;;  %vm2145_vm1 = vcmp.eq.f32.partialorder %v1088_v61, 8.507059e+37  ;;  %v2149_v10 = vadd.f32 1.0, %v1593_v5  ;;  %v694_v12 = vadd.f32 %v693_v44, %v515_v3  ;;  %vm1085_vm2 = vweird.f32 %v1591_v59 }
 0x1f9   : > { %v1082_v15 = vmul.f32 %v1591_v59, %v1081_v6  ;;  %v1091_v11 = vor.u32 1.1754944e-38, %v1090_v2  ;;  %v2154_v16 = vadd.f32 1.0, %v1595_v8  ;;  %vm1234_vm3 = vweird.f32 %v2122_v51  ;;  %vm1086_vm5 = vmor %vm1084_vm15, %vm1085_vm2 }
 0x1fa   : > { %v1597_v14 = vpop.eup %1596  ;;  %vm2164_vm4 = vcmp.eq.f32.partialorder %v1238_v4, 8.507059e+37  ;;  %1602 = vrcp.f32 %v2149_v10  ;;  %v1241_v28 = vor.u32 1.1754944e-38, %v1240_v7  ;;  %v724_v29 = vadd.f32 %v723_v49, %v525_v13  ;;  %v669_v13 = vpop.f32.mrf.mxu1 }
 0x1fb   : > { %v1230_v21 = vmul.f32 %v1597_v14, %v2122_v51  ;;  %v1083_v27 = vadd.f32 %v1591_v59, %v1082_v15  ;;  %1604 = vrcp.f32 %v2154_v16  ;;  %v1507_v32 = vmul.f32 -1.442695, %v694_v12  ;;  %v507_v12 = vld [vmem:[%s2579_s4 + $0x40] sm:$0xff] }
 0x1fc   : > { %v1599_v30 = vpop.eup %1598  ;;  %v667_v33 = vadd.f32 %v666_v18, %v506_v17  ;;  %v697_v23 = vadd.f32 %v696_v20, %v516_v19  ;;  %v953_v37 = vand.u32 2147483647, %v2149_v10  ;;  %v727_v39 = vadd.f32 %v726_v26, %v526_v25 }
 0x1fd   : > { %v1231_v31 = vsub.f32 1.0, %v1230_v21  ;;  %v1601_v35 = vpop.eup %1600  ;;  %v1087_v36 = vsel %vm1086_vm5, %v1591_v59, %v1083_v27  ;;  %v2177_v38 = vadd.f32 1.0, %v1599_v30  ;;  %vm1235_vm6 = vweird.f32 %v1597_v14 }
 0x1fe   : > { %v1092_v40 = vsel %vm2145_vm1, %v1091_v11, %v1087_v36  ;;  %v955_v42 = vand.u32 2147483648, %v2149_v10  ;;  %v1103_v22 = vand.u32 2147483647, %v2154_v16  ;;  %v1105_v34 = vand.u32 2147483648, %v2154_v16  ;;  %vm1236_vm8 = vmor %vm1234_vm3, %vm1235_vm6 }
 0x1ff   : > { %v1232_v41 = vmul.f32 %v1597_v14, %v1231_v31  ;;  %1363 = vst.msk [vmem:[%s2031_s13 + $0x70] sm:$0xff] %vm257_vm0, %v1092_v40  ;;  %1606 = vrcp.f32 %v2177_v38  ;;  %v1517_v43 = vmul.f32 -1.442695, %v724_v29  ;;  %vm949_vm7 = vweird.f32 %v2149_v10 }
 0x200   : > { %v1603_v44 = vpop.eup %1602  ;;  %v2188_v46 = vadd.f32 1.0, %v1601_v35  ;;  %1608 = vpow2.f32 %v1507_v32  ;;  %vm2193_vm9 = vcmp.eq.f32.partialorder %v953_v37, 8.507059e+37  ;;  %vm1099_vm10 = vweird.f32 %v2154_v16 }
 0x201   : > { %v1233_v45 = vadd.f32 %v1597_v14, %v1232_v41  ;;  %v1605_v47 = vpop.eup %1604  ;;  %v945_v48 = vmul.f32 %v1603_v44, %v2149_v10  ;;  %v1498_v50 = vmul.f32 -1.442695, %v667_v33  ;;  %v956_v54 = vor.u32 1.1754944e-38, %v955_v42  ;;  %v517_v33 = vld [vmem:[%s2579_s4 + $0x90] sm:$0xff] }
 0x202   : > { %v1095_v55 = vmul.f32 %v1605_v47, %v2154_v16  ;;  %1610 = vrcp.f32 %v2188_v46  ;;  %vm2202_vm11 = vcmp.eq.f32.partialorder %v1103_v22, 8.507059e+37  ;;  %v1106_v59 = vor.u32 1.1754944e-38, %v1105_v34 }
 0x203   : > { %v1237_v52 = vsel %vm1236_vm8, %v1597_v14, %v1233_v45  ;;  %v946_v51 = vsub.f32 1.0, %v945_v48  ;;  %v1255_v61 = vand.u32 2147483648, %v2177_v38  ;;  %1612 = vpow2.f32 %v1517_v43 }
 0x204   : > { %v1242_v56 = vsel %vm2164_vm4, %v1241_v28, %v1237_v52  ;;  %v1096_v60 = vsub.f32 1.0, %v1095_v55  ;;  %v1508_v62 = vmul.f32 -1.442695, %v697_v23  ;;  %vm950_vm12 = vweird.f32 %v1603_v44  ;;  %v699_v23 = vpop.f32.mrf.mxu2  ;;  %v527_v52 = vld [vmem:[%s2579_s4 + $0xe0] sm:$0xff] }
 0x205   : > { %1373 = vst.msk [vmem:[%s2031_s13 + $0xc0] sm:$0xff] %vm257_vm0, %v1242_v56  ;;  %v1607_v63 = vpop.eup %1606  ;;  %v947_v53 = vmul.f32 %v1603_v44, %v946_v51  ;;  %1614 = vpow2.f32 %v1498_v50  ;;  %v1518_v0 = vmul.f32 -1.442695, %v727_v39  ;;  %vm1100_vm13 = vweird.f32 %v1605_v47  ;;  %vm951_vm15 = vmor %vm949_vm7, %vm950_vm12 }
 0x206   : > { %v1609_v1 = vpop.eup %1608  ;;  %v1097_v2 = vmul.f32 %v1605_v47, %v1096_v60  ;;  %v1245_v3 = vmul.f32 %v1607_v63, %v2177_v38  ;;  %vm1249_vm14 = vweird.f32 %v2177_v38  ;;  %v1253_v4 = vand.u32 2147483647, %v2177_v38  ;;  %vm1101_vm1 = vmor %vm1099_vm10, %vm1100_vm13 }
 0x207   : > { %v948_v57 = vadd.f32 %v1603_v44, %v947_v53  ;;  %v2212_v5 = vadd.f32 1.0, %v1609_v1  ;;  %1616 = vpow2.f32 %v1508_v62  ;;  %v1256_v9 = vor.u32 1.1754944e-38, %v1255_v61 }
 0x208   : > { %v1611_v6 = vpop.eup %1610  ;;  %v1098_v7 = vadd.f32 %v1605_v47, %v1097_v2  ;;  %v1246_v8 = vsub.f32 1.0, %v1245_v3  ;;  %1618 = vpow2.f32 %v1518_v0  ;;  %v968_v10 = vand.u32 2147483647, %v2188_v46 }
 0x209   : > { %v952_v14 = vsel %vm951_vm15, %v1603_v44, %v948_v57  ;;  %v960_v15 = vmul.f32 %v1611_v6, %v2188_v46  ;;  %1620 = vrcp.f32 %v2212_v5  ;;  %v1613_v11 = vpop.eup %1612  ;;  %vm1250_vm2 = vweird.f32 %v1607_v63 }
 0x20a   : > { %v957_v17 = vsel %vm2193_vm9, %v956_v54, %v952_v14  ;;  %v1102_v18 = vsel %vm1101_vm1, %v1605_v47, %v1098_v7  ;;  %v1247_v19 = vmul.f32 %v1607_v63, %v1246_v8  ;;  %vm964_vm3 = vweird.f32 %v2188_v46  ;;  %vm1251_vm4 = vmor %vm1249_vm14, %vm1250_vm2  ;;  %v729_v54 = vpop.f32.mrf.mxu3  ;;  %v508_v14 = vld [vmem:[%s2579_s4 + $0x48] sm:$0xff] }
 0x20b   : > { %v1615_v20 = vpop.eup %1614  ;;  %1354 = vst.msk [vmem:[%s2031_s13 + $0x28] sm:$0xff] %vm257_vm0, %v957_v17  ;;  %v1107_v16 = vsel %vm2202_vm11, %v1106_v59, %v1102_v18  ;;  %v961_v21 = vsub.f32 1.0, %v960_v15  ;;  %v670_v24 = vadd.f32 %v669_v13, %v507_v12  ;;  %v970_v26 = vand.u32 2147483648, %v2188_v46  ;;  %v672_v15 = vpop.f32.mrf.mxu1 }
 0x20c   : > { %1364 = vst.msk [vmem:[%s2031_s13 + $0x78] sm:$0xff] %vm257_vm0, %v1107_v16  ;;  %v1248_v25 = vadd.f32 %v1607_v63, %v1247_v19  ;;  %v2235_v27 = vadd.f32 1.0, %v1613_v11  ;;  %v2237_v28 = vadd.f32 1.0, %v1615_v20  ;;  %vm965_vm5 = vweird.f32 %v1611_v6 }
 0x20d   : > { %v1617_v29 = vpop.eup %1616  ;;  %v962_v30 = vmul.f32 %v1611_v6, %v961_v21  ;;  %v1118_v31 = vand.u32 2147483647, %v2212_v5  ;;  %v1120_v32 = vand.u32 2147483648, %v2212_v5  ;;  %vm1254_vm6 = vcmp.eq.f32.partialorder %v1253_v4, 8.507059e+37  ;;  %vm966_vm8 = vmor %vm964_vm3, %vm965_vm5 }
 0x20e   : > { %v1619_v35 = vpop.eup %1618  ;;  %v1252_v36 = vsel %vm1251_vm4, %v1607_v63, %v1248_v25  ;;  %vm2246_vm7 = vcmp.eq.f32.partialorder %v968_v10, 8.507059e+37  ;;  %1622 = vrcp.f32 %v2235_v27  ;;  %v1499_v41 = vmul.f32 -1.442695, %v670_v24 }
 0x20f   : > { %v1621_v38 = vpop.eup %1620  ;;  %v1257_v39 = vsel %vm1254_vm6, %v1256_v9, %v1252_v36  ;;  %v963_v40 = vadd.f32 %v1611_v6, %v962_v30  ;;  %1624 = vrcp.f32 %v2237_v28  ;;  %v971_v42 = vor.u32 1.1754944e-38, %v970_v26 }
 0x210   : > { %1374 = vst.msk [vmem:[%s2031_s13 + $0xc8] sm:$0xff] %vm257_vm0, %v1257_v39  ;;  %v1110_v22 = vmul.f32 %v1621_v38, %v2212_v5  ;;  %vm1114_vm9 = vweird.f32 %v2212_v5  ;;  %v700_v34 = vadd.f32 %v699_v23, %v517_v33  ;;  %vm2259_vm10 = vcmp.eq.f32.partialorder %v1118_v31, 8.507059e+37  ;;  %v645_v31 = vpop.f32.mrf.mxu0  ;;  %v499_v39 = vld [vmem:[%s2579_s4] sm:$0xff] }
 0x211   : > { %v967_v43 = vsel %vm966_vm8, %v1611_v6, %v963_v40  ;;  %v1121_v45 = vor.u32 1.1754944e-38, %v1120_v32  ;;  %v1268_v47 = vand.u32 2147483647, %v2235_v27  ;;  %v2266_v49 = vadd.f32 1.0, %v1617_v29 }
 0x212   : > { %v972_v48 = vsel %vm2246_vm7, %v971_v42, %v967_v43  ;;  %v1111_v46 = vsub.f32 1.0, %v1110_v22  ;;  %v2268_v50 = vadd.f32 1.0, %v1619_v35  ;;  %v1270_v55 = vand.u32 2147483648, %v2235_v27  ;;  %v702_v22 = vpop.f32.mrf.mxu2 }
 0x213   : > { %1355 = vst.msk [vmem:[%s2031_s13 + $0x30] sm:$0xff] %vm257_vm0, %v972_v48  ;;  %v983_v56 = vand.u32 2147483647, %v2237_v28  ;;  %v985_v51 = vand.u32 2147483648, %v2237_v28  ;;  %1626 = vpow2.f32 %v1499_v41  ;;  %vm1115_vm11 = vweird.f32 %v1621_v38 }
 0x214   : > { %v1623_v58 = vpop.eup %1622  ;;  %v1112_v59 = vmul.f32 %v1621_v38, %v1111_v46  ;;  %1628 = vrcp.f32 %v2266_v49  ;;  %v1509_v60 = vmul.f32 -1.442695, %v700_v34  ;;  %vm1264_vm12 = vweird.f32 %v2235_v27  ;;  %vm1116_vm15 = vmor %vm1114_vm9, %vm1115_vm11 }
 0x215   : > { %v1625_v61 = vpop.eup %1624  ;;  %v1260_v62 = vmul.f32 %v1623_v58, %v2235_v27  ;;  %1630 = vrcp.f32 %v2268_v50  ;;  %v730_v63 = vadd.f32 %v729_v54, %v527_v52  ;;  %vm2282_vm13 = vcmp.eq.f32.partialorder %v1268_v47, 8.507059e+37 }
 0x216   : > { %v1113_v53 = vadd.f32 %v1621_v38, %v1112_v59  ;;  %v975_v1 = vmul.f32 %v1625_v61, %v2237_v28  ;;  %vm979_vm14 = vweird.f32 %v2237_v28  ;;  %v1271_v3 = vor.u32 1.1754944e-38, %v1270_v55 }
 0x217   : > { %v1261_v2 = vsub.f32 1.0, %v1260_v62  ;;  %vm2290_vm1 = vcmp.eq.f32.partialorder %v983_v56, 8.507059e+37  ;;  %v986_v4 = vor.u32 1.1754944e-38, %v985_v51  ;;  %v1133_v8 = vand.u32 2147483647, %v2266_v49  ;;  %v528_v51 = vld [vmem:[%s2579_s4 + $0xe8] sm:$0xff]  ;;  %v675_v62 = vpop.f32.mrf.mxu1 }
 0x218   : > { %v1117_v6 = vsel %vm1116_vm15, %v1621_v38, %v1113_v53  ;;  %v976_v7 = vsub.f32 1.0, %v975_v1  ;;  %1632 = vpow2.f32 %v1509_v60  ;;  %vm1265_vm2 = vweird.f32 %v1623_v58 }
 0x219   : > { %v1627_v9 = vpop.eup %1626  ;;  %v1122_v12 = vsel %vm2259_vm10, %v1121_v45, %v1117_v6  ;;  %v1262_v13 = vmul.f32 %v1623_v58, %v1261_v2  ;;  %v1519_v5 = vmul.f32 -1.442695, %v730_v63  ;;  %vm980_vm3 = vweird.f32 %v1625_v61  ;;  %vm1266_vm5 = vmor %vm1264_vm12, %vm1265_vm2  ;;  %v732_v45 = vpop.f32.mrf.mxu3 }
 0x21a   : > { %v1629_v10 = vpop.eup %1628  ;;  %1365 = vst.msk [vmem:[%s2031_s13 + $0x80] sm:$0xff] %vm257_vm0, %v1122_v12  ;;  %v977_v11 = vmul.f32 %v1625_v61, %v976_v7  ;;  %vm1129_vm4 = vweird.f32 %v2266_v49  ;;  %v2303_v17 = vadd.f32 1.0, %v1627_v9  ;;  %v1135_v16 = vand.u32 2147483648, %v2266_v49  ;;  %vm981_vm6 = vmor %vm979_vm14, %vm980_vm3  ;;  %v648_v9 = vpop.f32.mrf.mxu0 }
 0x21b   : > { %v1631_v18 = vpop.eup %1630  ;;  %v1263_v19 = vadd.f32 %v1623_v58, %v1262_v13  ;;  %v1125_v20 = vmul.f32 %v1629_v10, %v2266_v49  ;;  %1634 = vpow2.f32 %v1519_v5  ;;  %v673_v25 = vadd.f32 %v672_v15, %v508_v14  ;;  %v518_v49 = vld [vmem:[%s2579_s4 + $0x98] sm:$0xff] }
 0x21c   : > { %v978_v21 = vadd.f32 %v1625_v61, %v977_v11  ;;  %v1275_v24 = vmul.f32 %v1631_v18, %v2268_v50  ;;  %1636 = vrcp.f32 %v2303_v17  ;;  %vm2314_vm7 = vcmp.eq.f32.partialorder %v1133_v8, 8.507059e+37  ;;  %v500_v8 = vld [vmem:[%s2579_s4 + $0x8] sm:$0xff] }
 0x21d   : > { %v1267_v26 = vsel %vm1266_vm5, %v1623_v58, %v1263_v19  ;;  %v1126_v29 = vsub.f32 1.0, %v1125_v20  ;;  %v1283_v27 = vand.u32 2147483647, %v2268_v50  ;;  %v1285_v36 = vand.u32 2147483648, %v2268_v50 }
 0x21e   : > { %v1633_v32 = vpop.eup %1632  ;;  %v1272_v33 = vsel %vm2282_vm13, %v1271_v3, %v1267_v26  ;;  %v982_v23 = vsel %vm981_vm6, %v1625_v61, %v978_v21  ;;  %v1276_v35 = vsub.f32 1.0, %v1275_v24  ;;  %vm1130_vm8 = vweird.f32 %v1629_v10  ;;  %v509_v61 = vld [vmem:[%s2579_s4 + $0x50] sm:$0xff]  ;;  %v519_v24 = vld [vmem:[%s2579_s4 + $0xa0] sm:$0xff] }
 0x21f   : > { %1375 = vst.msk [vmem:[%s2031_s13 + $0xd0] sm:$0xff] %vm257_vm0, %v1272_v33  ;;  %v987_v28 = vsel %vm2290_vm1, %v986_v4, %v982_v23  ;;  %v1127_v37 = vmul.f32 %v1629_v10, %v1126_v29  ;;  %v2326_v38 = vadd.f32 1.0, %v1633_v32  ;;  %v1136_v40 = vor.u32 1.1754944e-38, %v1135_v16  ;;  %vm1131_vm12 = vmor %vm1129_vm4, %vm1130_vm8  ;;  %v678_v44 = vpop.f32.mrf.mxu1 }
 0x220   : > { %1356 = vst.msk [vmem:[%s2031_s13 + $0x38] sm:$0xff] %vm257_vm0, %v987_v28  ;;  %v1277_v41 = vmul.f32 %v1631_v18, %v1276_v35  ;;  %vm1280_vm9 = vweird.f32 %v1631_v18  ;;  %v1500_v42 = vmul.f32 -1.442695, %v673_v25  ;;  %vm1279_vm10 = vweird.f32 %v2268_v50  ;;  %v705_v25 = vpop.f32.mrf.mxu2 }
 0x221   : > { %v1635_v34 = vpop.eup %1634  ;;  %v1128_v43 = vadd.f32 %v1629_v10, %v1127_v37  ;;  %vm2334_vm11 = vcmp.eq.f32.partialorder %v1283_v27, 8.507059e+37  ;;  %1638 = vrcp.f32 %v2326_v38  ;;  %v646_v52 = vadd.f32 %v645_v31, %v499_v39  ;;  %vm1281_vm13 = vmor %vm1279_vm10, %vm1280_vm9  ;;  %v735_v27 = vpop.f32.mrf.mxu3 }
 0x222   : > { %v1637_v47 = vpop.eup %1636  ;;  %v1278_v48 = vadd.f32 %v1631_v18, %v1277_v41  ;;  %v2342_v46 = vadd.f32 1.0, %v1635_v34  ;;  %1640 = vpow2.f32 %v1500_v42  ;;  %v1286_v50 = vor.u32 1.1754944e-38, %v1285_v36 }
 0x223   : > { %v1132_v54 = vsel %vm1131_vm12, %v1629_v10, %v1128_v43  ;;  %v990_v55 = vmul.f32 %v1637_v47, %v2303_v17  ;;  %v998_v56 = vand.u32 2147483647, %v2303_v17  ;;  %v1000_v60 = vand.u32 2147483648, %v2303_v17  ;;  %v510_v43 = vld [vmem:[%s2579_s4 + $0x58] sm:$0xff] }
 0x224   : > { %v1137_v58 = vsel %vm2314_vm7, %v1136_v40, %v1132_v54  ;;  %v1282_v59 = vsel %vm1281_vm13, %v1631_v18, %v1278_v48  ;;  %1642 = vrcp.f32 %v2342_v46  ;;  %vm994_vm14 = vweird.f32 %v2303_v17  ;;  %v529_v17 = vld [vmem:[%s2579_s4 + $0xf0] sm:$0xff] }
 0x225   : > { %1366 = vst.msk [vmem:[%s2031_s13 + $0x88] sm:$0xff] %vm257_vm0, %v1137_v58  ;;  %v1287_v63 = vsel %vm2334_vm11, %v1286_v50, %v1282_v59  ;;  %v991_v53 = vsub.f32 1.0, %v990_v55  ;;  %v1150_v0 = vand.u32 2147483648, %v2326_v38  ;;  %v1491_v1 = vmul.f32 -1.442695, %v646_v52 }
 0x226   : > { %1376 = vst.msk [vmem:[%s2031_s13 + $0xd8] sm:$0xff] %vm257_vm0, %v1287_v63  ;;  %v703_v2 = vadd.f32 %v702_v22, %v518_v49  ;;  %v733_v3 = vadd.f32 %v732_v45, %v528_v51  ;;  %vm995_vm15 = vweird.f32 %v1637_v47  ;;  %vm2368_vm1 = vcmp.eq.f32.partialorder %v998_v56, 8.507059e+37 }
 0x227   : > { %v1639_v57 = vpop.eup %1638  ;;  %v992_v4 = vmul.f32 %v1637_v47, %v991_v53  ;;  %v676_v7 = vadd.f32 %v675_v62, %v509_v61  ;;  %v1001_v13 = vor.u32 1.1754944e-38, %v1000_v60  ;;  %vm1144_vm2 = vweird.f32 %v2326_v38  ;;  %vm996_vm3 = vmor %vm994_vm14, %vm995_vm15 }
 0x228   : > { %v1641_v12 = vpop.eup %1640  ;;  %v1140_v5 = vmul.f32 %v1639_v57, %v2326_v38  ;;  %1644 = vpow2.f32 %v1491_v1  ;;  %v1148_v15 = vand.u32 2147483647, %v2326_v38  ;;  %v1510_v11 = vmul.f32 -1.442695, %v703_v2  ;;  %v520_v1 = vld [vmem:[%s2579_s4 + $0xa8] sm:$0xff]  ;;  %v708_v2 = vpop.f32.mrf.mxu2 }
 0x229   : > { %v993_v14 = vadd.f32 %v1637_v47, %v992_v4  ;;  %v2378_v10 = vadd.f32 1.0, %v1641_v12  ;;  %v1151_v20 = vor.u32 1.1754944e-38, %v1150_v0  ;;  %v1520_v16 = vmul.f32 -1.442695, %v733_v3 }
 0x22a   : > { %v1643_v18 = vpop.eup %1642  ;;  %v1141_v19 = vsub.f32 1.0, %v1140_v5  ;;  %v649_v21 = vadd.f32 %v648_v9, %v500_v8  ;;  %v1501_v30 = vmul.f32 -1.442695, %v676_v7  ;;  %vm1145_vm4 = vweird.f32 %v1639_v57 }
 0x22b   : > { %v997_v26 = vsel %vm996_vm3, %v1637_v47, %v993_v14  ;;  %v1290_v29 = vmul.f32 %v1643_v18, %v2342_v46  ;;  %1646 = vrcp.f32 %v2378_v10  ;;  %v1298_v33 = vand.u32 2147483647, %v2342_v46  ;;  %vm1146_vm5 = vmor %vm1144_vm2, %vm1145_vm4 }
 0x22c   : > { %v1002_v31 = vsel %vm2368_vm1, %v1001_v13, %v997_v26  ;;  %v1142_v32 = vmul.f32 %v1639_v57, %v1141_v19  ;;  %v1300_v35 = vand.u32 2147483648, %v2342_v46  ;;  %1648 = vpow2.f32 %v1510_v11  ;;  %v738_v19 = vpop.f32.mrf.mxu3 }
 0x22d   : > { %1357 = vst.msk [vmem:[%s2031_s13 + $0x40] sm:$0xff] %vm257_vm0, %v1002_v31  ;;  %v1291_v23 = vsub.f32 1.0, %v1290_v29  ;;  %v706_v36 = vadd.f32 %v705_v25, %v519_v24  ;;  %1650 = vpow2.f32 %v1520_v16  ;;  %v1492_v39 = vmul.f32 -1.442695, %v649_v21 }
 0x22e   : > { %v1645_v28 = vpop.eup %1644  ;;  %v1143_v37 = vadd.f32 %v1639_v57, %v1142_v32  ;;  %v736_v40 = vadd.f32 %v735_v27, %v529_v17  ;;  %vm1295_vm6 = vweird.f32 %v1643_v18  ;;  %1652 = vpow2.f32 %v1501_v30 }
 0x22f   : > { %v1292_v41 = vmul.f32 %v1643_v18, %v1291_v23  ;;  %v2399_v42 = vadd.f32 1.0, %v1645_v28  ;;  %vm1149_vm7 = vcmp.eq.f32.partialorder %v1148_v15, 8.507059e+37  ;;  %vm1294_vm8 = vweird.f32 %v2342_v46 }
 0x230   : > { %v1147_v22 = vsel %vm1146_vm5, %v1639_v57, %v1143_v37  ;;  %v1013_v34 = vand.u32 2147483647, %v2378_v10  ;;  %v1511_v48 = vmul.f32 -1.442695, %v706_v36  ;;  %vm1296_vm9 = vmor %vm1294_vm8, %vm1295_vm6  ;;  %vm1299_vm10 = vcmp.eq.f32.partialorder %v1298_v33, 8.507059e+37 }
 0x231   : > { %v1647_v45 = vpop.eup %1646  ;;  %v1152_v38 = vsel %vm1149_vm7, %v1151_v20, %v1147_v22  ;;  %v1293_v47 = vadd.f32 %v1643_v18, %v1292_v41  ;;  %1654 = vrcp.f32 %v2399_v42  ;;  %v1301_v46 = vor.u32 1.1754944e-38, %v1300_v35 }
 0x232   : > { %1367 = vst.msk [vmem:[%s2031_s13 + $0x90] sm:$0xff] %vm257_vm0, %v1152_v38  ;;  %v1005_v52 = vmul.f32 %v1647_v45, %v2378_v10  ;;  %v1521_v54 = vmul.f32 -1.442695, %v736_v40  ;;  %v1649_v50 = vpop.eup %1648  ;;  %v1015_v56 = vand.u32 2147483648, %v2378_v10  ;;  %1656 = vpow2.f32 %v1492_v39 }
 0x233   : > { %v1297_v55 = vsel %vm1296_vm9, %v1643_v18, %v1293_v47  ;;  %v679_v49 = vadd.f32 %v678_v44, %v510_v43  ;;  %v1651_v51 = vpop.eup %1650  ;;  %vm1009_vm11 = vweird.f32 %v2378_v10  ;;  %vm2415_vm12 = vcmp.eq.f32.partialorder %v1013_v34, 8.507059e+37  ;;  %v530_v18 = vld [vmem:[%s2579_s4 + $0xf8] sm:$0xff] }
 0x234   : > { %v1302_v58 = vsel %vm1299_vm10, %v1301_v46, %v1297_v55  ;;  %v1006_v59 = vsub.f32 1.0, %v1005_v52  ;;  %v1653_v60 = vpop.eup %1652  ;;  %v2419_v62 = vadd.f32 1.0, %v1649_v50  ;;  %v2421_v63 = vadd.f32 1.0, %v1651_v51 }
 0x235   : > { %1377 = vst.msk [vmem:[%s2031_s13 + $0xe0] sm:$0xff] %vm257_vm0, %v1302_v58  ;;  %1658 = vpow2.f32 %v1511_v48  ;;  %vm1010_vm13 = vweird.f32 %v1647_v45  ;;  %v2423_v0 = vadd.f32 1.0, %v1653_v60  ;;  %v1016_v57 = vor.u32 1.1754944e-38, %v1015_v56 }
 0x236   : > { %v1007_v53 = vmul.f32 %v1647_v45, %v1006_v59  ;;  %1660 = vpow2.f32 %v1521_v54  ;;  %vm874_vm14 = vweird.f32 %v2399_v42  ;;  %v1502_v4 = vmul.f32 -1.442695, %v679_v49  ;;  %vm1011_vm15 = vmor %vm1009_vm11, %vm1010_vm13 }
 0x237   : > { %v1655_v3 = vpop.eup %1654  ;;  %1662 = vrcp.f32 %v2419_v62  ;;  %v878_v8 = vand.u32 2147483647, %v2399_v42  ;;  %v880_v12 = vand.u32 2147483648, %v2399_v42  ;;  %v1163_v13 = vand.u32 2147483647, %v2419_v62 }
 0x238   : > { %v1008_v6 = vadd.f32 %v1647_v45, %v1007_v53  ;;  %v870_v7 = vmul.f32 %v1655_v3, %v2399_v42  ;;  %1664 = vrcp.f32 %v2421_v63  ;;  %v1657_v9 = vpop.eup %1656  ;;  %v1165_v5 = vand.u32 2147483648, %v2419_v62 }
 0x239   : > { %v709_v14 = vadd.f32 %v708_v2, %v520_v1  ;;  %vm875_vm1 = vweird.f32 %v1655_v3  ;;  %1666 = vrcp.f32 %v2423_v0  ;;  %vm2447_vm2 = vcmp.eq.f32.partialorder %v878_v8, 8.507059e+37 }
 0x23a   : > { %v1012_v15 = vsel %vm1011_vm15, %v1647_v45, %v1008_v6  ;;  %v871_v11 = vsub.f32 1.0, %v870_v7  ;;  %1668 = vpow2.f32 %v1502_v4  ;;  %v1313_v25 = vand.u32 2147483647, %v2421_v63  ;;  %vm2456_vm3 = vmor %vm874_vm14, %vm875_vm1 }
 0x23b   : > { %v1659_v10 = vpop.eup %1658  ;;  %v1017_v20 = vsel %vm2415_vm12, %v1016_v57, %v1012_v15  ;;  %v2452_v26 = vadd.f32 1.0, %v1657_v9  ;;  %v881_v17 = vor.u32 1.1754944e-38, %v880_v12  ;;  %vm1159_vm4 = vweird.f32 %v2419_v62 }
 0x23c   : > { %v1661_v16 = vpop.eup %1660  ;;  %1358 = vst.msk [vmem:[%s2031_s13 + $0x48] sm:$0xff] %vm257_vm0, %v1017_v20  ;;  %v872_v21 = vmul.f32 %v1655_v3, %v871_v11  ;;  %v2461_v27 = vmul.f32 -1.442695, %v709_v14  ;;  %v2463_v31 = vadd.f32 %v738_v19, %v530_v18  ;;  %vm2466_vm5 = vcmp.eq.f32.partialorder %v1163_v13, 8.507059e+37 }
 0x23d   : > { %v1663_v29 = vpop.eup %1662  ;;  %v1166_v36 = vor.u32 1.1754944e-38, %v1165_v5  ;;  %v2470_v28 = vadd.f32 1.0, %v1659_v10  ;;  %vm1309_vm6 = vweird.f32 %v2421_v63  ;;  %v1315_v39 = vand.u32 2147483648, %v2421_v63 }
 0x23e   : > { %v1665_v32 = vpop.eup %1664  ;;  %v873_v33 = vadd.f32 %v1655_v3, %v872_v21  ;;  %v1155_v23 = vmul.f32 %v1663_v29, %v2419_v62  ;;  %1670 = vrcp.f32 %v2452_v26  ;;  %vm2478_vm7 = vcmp.eq.f32.partialorder %v1313_v25, 8.507059e+37 }
 0x23f   : > { %v1305_v37 = vmul.f32 %v1665_v32, %v2421_v63  ;;  %v1667_v40 = vpop.eup %1666  ;;  %v2482_v34 = vadd.f32 1.0, %v1661_v16  ;;  %v1030_v47 = vand.u32 2147483648, %v2423_v0  ;;  %vm1160_vm8 = vweird.f32 %v1663_v29 }
 0x240   : > { %v877_v41 = vsel %vm2456_vm3, %v1655_v3, %v873_v33  ;;  %v1156_v42 = vsub.f32 1.0, %v1155_v23  ;;  %v1669_v43 = vpop.eup %1668  ;;  %v1020_v38 = vmul.f32 %v1667_v40, %v2423_v0  ;;  %vm1024_vm9 = vweird.f32 %v2423_v0  ;;  %vm1161_vm11 = vmor %vm1159_vm4, %vm1160_vm8 }
 0x241   : > { %v882_v44 = vsel %vm2447_vm2, %v881_v17, %v877_v41  ;;  %v1306_v45 = vsub.f32 1.0, %v1305_v37  ;;  %1672 = vrcp.f32 %v2470_v28  ;;  %vm1310_vm10 = vweird.f32 %v1665_v32 }
 0x242   : > { %1349 = vst.msk [vmem:[%s2031_s13] sm:$0xff] %vm257_vm0, %v882_v44  ;;  %v1157_v48 = vmul.f32 %v1663_v29, %v1156_v42  ;;  %v1021_v52 = vsub.f32 1.0, %v1020_v38  ;;  %v1028_v54 = vand.u32 2147483647, %v2423_v0  ;;  %v1316_v55 = vor.u32 1.1754944e-38, %v1315_v39  ;;  %vm1311_vm13 = vmor %vm1309_vm6, %vm1310_vm10 }
 0x243   : > { %v1307_v46 = vmul.f32 %v1665_v32, %v1306_v45  ;;  %1674 = vrcp.f32 %v2482_v34  ;;  %v2494_v56 = vadd.f32 1.0, %v1669_v43  ;;  %vm1025_vm12 = vweird.f32 %v1667_v40 }
 0x244   : > { %v1158_v50 = vadd.f32 %v1663_v29, %v1157_v48  ;;  %v1671_v49 = vpop.eup %1670  ;;  %v1022_v58 = vmul.f32 %v1667_v40, %v1021_v52  ;;  %v1031_v59 = vor.u32 1.1754944e-38, %v1030_v47  ;;  %v893_v53 = vand.u32 2147483647, %v2452_v26  ;;  %vm1026_vm15 = vmor %vm1024_vm9, %vm1025_vm12 }
 0x245   : > { %v1308_v51 = vadd.f32 %v1665_v32, %v1307_v46  ;;  %v885_v61 = vmul.f32 %v1671_v49, %v2452_v26  ;;  %v895_v1 = vand.u32 2147483648, %v2452_v26  ;;  %vm889_vm14 = vweird.f32 %v2452_v26 }
 0x246   : > { %v1162_v60 = vsel %vm1161_vm11, %v1663_v29, %v1158_v50  ;;  %v1023_v3 = vadd.f32 %v1667_v40, %v1022_v58  ;;  %vm890_vm1 = vweird.f32 %v1671_v49  ;;  %1676 = vrcp.f32 %v2494_v56 }
 0x247   : > { %v1167_v62 = vsel %vm2466_vm5, %v1166_v36, %v1162_v60  ;;  %v1312_v2 = vsel %vm1311_vm13, %v1665_v32, %v1308_v51  ;;  %v1673_v57 = vpop.eup %1672  ;;  %v886_v4 = vsub.f32 1.0, %v885_v61  ;;  %vm1029_vm2 = vcmp.eq.f32.partialorder %v1028_v54, 8.507059e+37  ;;  %vm2524_vm4 = vmor %vm889_vm14, %vm890_vm1 }
 0x248   : > { %1368 = vst.msk [vmem:[%s2031_s13 + $0x98] sm:$0xff] %vm257_vm0, %v1167_v62  ;;  %v1317_v63 = vsel %vm2478_vm7, %v1316_v55, %v1312_v2  ;;  %v1027_v6 = vsel %vm1026_vm15, %v1667_v40, %v1023_v3  ;;  %v1170_v7 = vmul.f32 %v1673_v57, %v2470_v28  ;;  %vm2516_vm3 = vcmp.eq.f32.partialorder %v893_v53, 8.507059e+37 }
 0x249   : > { %1378 = vst.msk [vmem:[%s2031_s13 + $0xe8] sm:$0xff] %vm257_vm0, %v1317_v63  ;;  %v1675_v8 = vpop.eup %1674  ;;  %v1032_v9 = vsel %vm1029_vm2, %v1031_v59, %v1027_v6  ;;  %v887_v12 = vmul.f32 %v1671_v49, %v886_v4  ;;  %v896_v5 = vor.u32 1.1754944e-38, %v895_v1  ;;  %v1178_v15 = vand.u32 2147483647, %v2470_v28 }
 0x24a   : > { %1359 = vst.msk [vmem:[%s2031_s13 + $0x50] sm:$0xff] %vm257_vm0, %v1032_v9  ;;  %v1171_v14 = vsub.f32 1.0, %v1170_v7  ;;  %v1180_v11 = vand.u32 2147483648, %v2470_v28  ;;  %v1320_v18 = vmul.f32 %v1675_v8, %v2482_v34  ;;  %v1328_v10 = vand.u32 2147483647, %v2482_v34 }
 0x24b   : > { %v888_v19 = vadd.f32 %v1671_v49, %v887_v12  ;;  %1678 = vpow2.f32 %v2461_v27  ;;  %v1522_v20 = vmul.f32 -1.442695, %v2463_v31  ;;  %vm1174_vm5 = vweird.f32 %v2470_v28 }
 0x24c   : > { %v1172_v16 = vmul.f32 %v1673_v57, %v1171_v14  ;;  %vm1175_vm6 = vweird.f32 %v1673_v57  ;;  %v1321_v21 = vsub.f32 1.0, %v1320_v18  ;;  %v1677_v24 = vpop.eup %1676  ;;  %vm1325_vm7 = vweird.f32 %v1675_v8 }
 0x24d   : > { %v892_v25 = vsel %vm2524_vm4, %v1671_v49, %v888_v19  ;;  %v1330_v26 = vand.u32 2147483648, %v2482_v34  ;;  %1680 = vpow2.f32 %v1522_v20  ;;  %v1035_v27 = vmul.f32 %v1677_v24, %v2494_v56  ;;  %vm1176_vm8 = vmor %vm1174_vm5, %vm1175_vm6 }
 0x24e   : > { %v897_v29 = vsel %vm2516_vm3, %v896_v5, %v892_v25  ;;  %v1173_v30 = vadd.f32 %v1673_v57, %v1172_v16  ;;  %v1322_v17 = vmul.f32 %v1675_v8, %v1321_v21  ;;  %vm1179_vm9 = vcmp.eq.f32.partialorder %v1178_v15, 8.507059e+37 }
 0x24f   : > { %1350 = vst.msk [vmem:[%s2031_s13 + $0x8] sm:$0xff] %vm257_vm0, %v897_v29  ;;  %v1181_v31 = vor.u32 1.1754944e-38, %v1180_v11  ;;  %vm1324_vm10 = vweird.f32 %v2482_v34  ;;  %vm2544_vm11 = vcmp.eq.f32.partialorder %v1328_v10, 8.507059e+37  ;;  %v1036_v35 = vsub.f32 1.0, %v1035_v27 }
 0x250   : > { %v1177_v33 = vsel %vm1176_vm8, %v1673_v57, %v1173_v30  ;;  %v1323_v23 = vadd.f32 %v1675_v8, %v1322_v17  ;;  %vm1039_vm12 = vweird.f32 %v2494_v56  ;;  %vm1326_vm13 = vmor %vm1324_vm10, %vm1325_vm7  ;;  %v1331_v37 = vor.u32 1.1754944e-38, %v1330_v26 }
 0x251   : > { %v1679_v36 = vpop.eup %1678  ;;  %v1182_v28 = vsel %vm1179_vm9, %v1181_v31, %v1177_v33  ;;  %v1043_v39 = vand.u32 2147483647, %v2494_v56  ;;  %v1045_v40 = vand.u32 2147483648, %v2494_v56  ;;  %v1037_v42 = vmul.f32 %v1677_v24, %v1036_v35 }
 0x252   : > { %1369 = vst.msk [vmem:[%s2031_s13 + $0xa0] sm:$0xff] %vm257_vm0, %v1182_v28  ;;  %v1327_v41 = vsel %vm1326_vm13, %v1675_v8, %v1323_v23  ;;  %vm1040_vm14 = vweird.f32 %v1677_v24  ;;  %v858_v22 = vadd.f32 1.0, %v1679_v36 }
 0x253   : > { %v1681_v34 = vpop.eup %1680  ;;  %v1332_v43 = vsel %vm2544_vm11, %v1331_v37, %v1327_v41  ;;  %v1038_v44 = vadd.f32 %v1677_v24, %v1037_v42  ;;  %vm1041_vm15 = vmor %vm1039_vm12, %vm1040_vm14  ;;  %v1046_v45 = vor.u32 1.1754944e-38, %v1045_v40  ;;  %vm1044_vm1 = vcmp.eq.f32.partialorder %v1043_v39, 8.507059e+37 }
 0x254   : > { %1379 = vst.msk [vmem:[%s2031_s13 + $0xf0] sm:$0xff] %vm257_vm0, %v1332_v43  ;;  %1682 = vrcp.f32 %v858_v22  ;;  %v868_v38 = vadd.f32 1.0, %v1681_v34  ;;  %v1195_v55 = vand.u32 2147483648, %v858_v22  ;;  %v1193_v58 = vand.u32 2147483647, %v858_v22 }
 0x255   : > { %v1042_v47 = vsel %vm1041_vm15, %v1677_v24, %v1038_v44  ;;  %vm1189_vm3 = vweird.f32 %v858_v22 }
 0x256   : > { %v1047_v48 = vsel %vm1044_vm1, %v1046_v45, %v1042_v47  ;;  %1684 = vrcp.f32 %v868_v38  ;;  %v1345_v60 = vand.u32 2147483648, %v868_v38  ;;  %v1196_v61 = vor.u32 1.1754944e-38, %v1195_v55 }
 0x257   : > { %1360 = vst.msk [vmem:[%s2031_s13 + $0x58] sm:$0xff] %vm257_vm0, %v1047_v48  ;;  %v1343_v1 = vand.u32 2147483647, %v868_v38  ;;  %vm1194_vm6 = vcmp.eq.f32.partialorder %v1193_v58, 8.507059e+37  ;;  %vm1339_vm7 = vweird.f32 %v868_v38 }
 0x258   : > { %v1346_v57 = vor.u32 1.1754944e-38, %v1345_v60 }
 0x259   : > { %vm1344_vm9 = vcmp.eq.f32.partialorder %v1343_v1, 8.507059e+37 }
 0x25a   : > { %v1683_v46 = vpop.eup %1682 }
 0x25b   : > { %v1185_v52 = vmul.f32 %v1683_v46, %v858_v22  ;;  %vm1190_vm2 = vweird.f32 %v1683_v46 }
 0x25c   : > { %v1685_v54 = vpop.eup %1684  ;;  %vm1191_vm4 = vmor %vm1189_vm3, %vm1190_vm2 }
 0x25d   : > { %v1186_v50 = vsub.f32 1.0, %v1185_v52  ;;  %v1335_v49 = vmul.f32 %v1685_v54, %v868_v38  ;;  %vm1340_vm5 = vweird.f32 %v1685_v54 }
 0x25e   : > { %vm1341_vm8 = vmor %vm1339_vm7, %vm1340_vm5 }
 0x25f   : > { %v1187_v51 = vmul.f32 %v1683_v46, %v1186_v50  ;;  %v1336_v56 = vsub.f32 1.0, %v1335_v49 }
 0x261   : > { %v1188_v59 = vadd.f32 %v1683_v46, %v1187_v51  ;;  %v1337_v53 = vmul.f32 %v1685_v54, %v1336_v56 }
 0x263   : > { %v1192_v62 = vsel %vm1191_vm4, %v1683_v46, %v1188_v59  ;;  %v1338_v3 = vadd.f32 %v1685_v54, %v1337_v53 }
 0x264   : > { %v1197_v2 = vsel %vm1194_vm6, %v1196_v61, %v1192_v62 }
 0x265   : > { %1370 = vst.msk [vmem:[%s2031_s13 + $0xa8] sm:$0xff] %vm257_vm0, %v1197_v2  ;;  %v1342_v63 = vsel %vm1341_vm8, %v1685_v54, %v1338_v3 }
 0x266   : > { %v1347_v4 = vsel %vm1344_vm9, %v1346_v57, %v1342_v63 }
 0x267   : > { %1380 = vst.msk [vmem:[%s2031_s13 + $0xf8] sm:$0xff] %vm257_vm0, %v1347_v4 }
 0x268 PF: > { %s15_s20 = sadd.s32 1, %s1708_s20   ;;  %s2631_s18 = smov %s1704_s19 }
 0x269   : > { %p12_p5 = scmp.ge.s32.totalorder %s15_s20, 4   ;;  %s2632_s19 = smov %s2634_s21 }
 0x26b   :  { %14 = sbr.rel (!%p12_p5) target bundleno = 2 (0x2), region = 78 }

</bundles_post_ra>
